<compile_context>
chip_gen: v7x
topology: tpu7x:2x2x1
jax: 0.10.0
libtpu: 0.0.40
codegen_flags: <defaults>
</compile_context>

<pallas_src>
import jax
import jax.numpy as jnp
from jax.experimental import pallas as pl
from jax.experimental.pallas import tpu as pltpu


def attention_kernel(node1_ref, w1_ref, out_ref):
    """node1_ref: (N, D, TB) VMEM   w1_ref: (D, 1) VMEM   out_ref: (N, TB) VMEM.

    Batch (TB) is the lane axis, so every reduce and the store are lane-dense.
    """
    x = node1_ref[...].astype(jnp.float32)             # (N, D, TB)
    w = w1_ref[...].astype(jnp.float32)                # (D, 1)

    # Linear(D -> 1) as broadcast-multiply + sublane reduce over D.
    # No MXU, no transpose, no bias (softmax over N is shift-invariant).
    logits = jnp.sum(x * w[None, :, :], axis=1)        # (N, TB)

    # Numerically-stable softmax over the neighbor axis (N = 8 sublanes).
    m = jnp.max(logits, axis=0, keepdims=True)         # (1, TB)
    e = jnp.exp(logits - m)                            # (N, TB)
    denom = jnp.sum(e, axis=0, keepdims=True)          # (1, TB)
    out_ref[...] = (e / denom).astype(out_ref.dtype)   # exact normalization


def _round_up(x, m):
    return ((x + m - 1) // m) * m


def attention_forward_batched(node1_b, w1, b1=None, *, tile_b=1024,
                              vmem_limit_bytes=None):
    """Batched attention: B independent (N, D) problems.

    node1_b: (B, N, D), f32 or bf16    w1: (1, D)    b1: accepted but unused
    returns att: (B, N) float32 -- softmax over N, independently per batch row.
    """
    del b1  # softmax(x + b, axis=N) == softmax(x, axis=N): bias is a no-op here
    B, N, D = node1_b.shape

    # Batch tile is the lane (last) dim of every block -> multiple of 128.
    tile_b = max(128, (int(tile_b) // 128) * 128)
    tile_b = min(tile_b, _round_up(B, 128))
    b_pad = _round_up(B, tile_b)
    if b_pad != B:  # ragged tail: zero-pad, slice off after the kernel
        node1_b = jnp.pad(node1_b, ((0, b_pad - B), (0, 0), (0, 0)))

    # Layout plumbing (outside the kernel): put batch on the lane axis.
    node1_t = jnp.transpose(node1_b, (1, 2, 0))        # (N, D, b_pad)
    w1_col = jnp.asarray(w1, jnp.float32).reshape(D, 1)

    grid = (b_pad // tile_b,)

    att_t = pl.pallas_call(
        attention_kernel,
        out_shape=jax.ShapeDtypeStruct((N, b_pad), jnp.float32),
        grid=grid,
        in_specs=[
            pl.BlockSpec((N, D, tile_b), lambda b: (0, 0, b)),   # node1 tile
            pl.BlockSpec((D, 1), lambda b: (0, 0)),              # W1 (resident)
        ],
        out_specs=pl.BlockSpec((N, tile_b), lambda b: (0, b)),   # lane-dense
        compiler_params=pltpu.CompilerParams(
            dimension_semantics=("parallel",),          # megacore / v7x 2-TC shard
            vmem_limit_bytes=vmem_limit_bytes),
    )(node1_t, w1_col)

    return att_t.T[:B]                                  # (B, N)


def attention_forward(node1, w1, b1, u_rep=None, num_neighs=None):
    """PyTorch-signature forward: node1 (N, D) -> att (N, 1).

    Plain jnp: a single (8, 32) problem is pure launch overhead as a Pallas
    kernel, so it is left to XLA fusion (per perf review).  u_rep / num_neighs
    are accepted for interface fidelity but unused, exactly as in the reference.
    """
    del u_rep, num_neighs
    logits = node1 @ jnp.asarray(w1).T + jnp.asarray(b1)   # (N, 1)
    return jax.nn.softmax(logits, axis=0)


if __name__ == "__main__":
    embed_dim = 32     # D
    num_neighs = 8     # N
    batch = 1024       # B: independent attention problems (graph nodes)

    key = jax.random.PRNGKey(0)
    k_node, k_batch, k_urep, k_w, k_b = jax.random.split(key, 5)

    # Parameters of att1 = nn.Linear(embed_dim, 1) (PyTorch default init range).
    bound = 1.0 / (embed_dim ** 0.5)
    w1 = jax.random.uniform(k_w, (1, embed_dim), minval=-bound, maxval=bound,
                            dtype=jnp.float32)
    b1 = jax.random.uniform(k_b, (1,), minval=-bound, maxval=bound,
                            dtype=jnp.float32)

    # ---- batched Pallas path (bf16 inputs: halves HBM read traffic) ----
    node1_b = jax.random.normal(
        k_batch, (batch, num_neighs, embed_dim), dtype=jnp.float32
    ).astype(jnp.bfloat16)

    att_b = attention_forward_batched(node1_b, w1, b1, tile_b=512)  # grid of 2
    att_b = jax.block_until_ready(att_b)

    node1_f32 = node1_b.astype(jnp.float32)
    logits_ref = jnp.einsum("bnd,d->bn", node1_f32, w1[0]) + b1[0]
    att_ref = jax.nn.softmax(logits_ref, axis=-1)
    assert att_b.shape == (batch, num_neighs)
    assert jnp.allclose(att_b, att_ref, atol=1e-4, rtol=1e-4)
    assert jnp.allclose(jnp.sum(att_b, axis=-1), 1.0, atol=1e-5)

    # ---- ragged batch (not a multiple of the tile): pad + slice path ----
    att_r = attention_forward_batched(node1_b[:300], w1, b1, tile_b=512)
    att_r = jax.block_until_ready(att_r)
    assert att_r.shape == (300, num_neighs)
    assert jnp.allclose(att_r, att_ref[:300], atol=1e-4, rtol=1e-4)

    # ---- single-problem path, PyTorch signature (plain jnp, no kernel) ----
    node1 = jax.random.normal(k_node, (num_neighs, embed_dim), dtype=jnp.float32)
    u_rep = jax.random.normal(k_urep, (num_neighs, embed_dim), dtype=jnp.float32)
    att = attention_forward(node1, w1, b1, u_rep, num_neighs)
    att = jax.block_until_ready(att)
    att_1_ref = jax.nn.softmax(node1 @ w1.T + b1, axis=0)
    assert att.shape == (num_neighs, 1)
    assert jnp.allclose(att, att_1_ref, atol=1e-6, rtol=1e-6)

    print("KERNEL_OK")
</pallas_src>

<mosaic_0001>
module attributes {stable_mosaic.version = 11 : i64} {
  func.func @attention_kernel(%arg0: i32, %arg1: memref<8x32x512xbf16, #tpu.memory_space<vmem>>, %arg2: memref<32x1xf32, #tpu.memory_space<vmem>>, %arg3: memref<8x512xf32, #tpu.memory_space<vmem>>) attributes {dimension_semantics = [#tpu.dimension_semantics<parallel>], iteration_bounds = array<i64: 2>, scalar_prefetch = 0 : i64, scratch_operands = 0 : i64, tpu.core_type = #tpu.core_type<tc>, window_params = [{transform_indices = @transform_0, window_bounds = array<i64: 8, 32, 512>}, {pipeline_mode = #tpu.pipeline_mode<synchronous>, transform_indices = @transform_1, window_bounds = array<i64: 32, 1>}, {transform_indices = @transform_2, window_bounds = array<i64: 8, 512>}]} {
    %c0 = arith.constant 0 : index
    %c0_0 = arith.constant 0 : index
    %c0_1 = arith.constant 0 : index
    %0 = vector.load %arg1[%c0, %c0_0, %c0_1] : memref<8x32x512xbf16, #tpu.memory_space<vmem>>, vector<8x32x512xbf16>
    %1 = arith.extf %0 : vector<8x32x512xbf16> to vector<8x32x512xf32>
    %c0_2 = arith.constant 0 : index
    %c0_3 = arith.constant 0 : index
    %2 = vector.load %arg2[%c0_2, %c0_3] : memref<32x1xf32, #tpu.memory_space<vmem>>, vector<32x1xf32>
    %3 = vector.shape_cast %2 : vector<32x1xf32> to vector<1x32x1xf32>
    %4 = vector.broadcast %3 : vector<1x32x1xf32> to vector<8x32x512xf32>
    %5 = arith.mulf %1, %4 : vector<8x32x512xf32>
    %cst = arith.constant dense<0.000000e+00> : vector<8x512xf32>
    %6 = vector.multi_reduction <add>, %5, %cst [1] : vector<8x32x512xf32> to vector<8x512xf32>
    %cst_4 = arith.constant dense<0xFF800000> : vector<512xf32>
    %7 = vector.multi_reduction <maximumf>, %6, %cst_4 [0] : vector<8x512xf32> to vector<512xf32>
    %8 = vector.shape_cast %7 : vector<512xf32> to vector<1x512xf32>
    %9 = vector.broadcast %8 : vector<1x512xf32> to vector<8x512xf32>
    %10 = arith.subf %6, %9 : vector<8x512xf32>
    %11 = math.exp %10 : vector<8x512xf32>
    %cst_5 = arith.constant dense<0.000000e+00> : vector<512xf32>
    %12 = vector.multi_reduction <add>, %11, %cst_5 [0] : vector<8x512xf32> to vector<512xf32>
    %13 = vector.shape_cast %12 : vector<512xf32> to vector<1x512xf32>
    %14 = vector.broadcast %13 : vector<1x512xf32> to vector<8x512xf32>
    %15 = arith.divf %11, %14 : vector<8x512xf32>
    %c0_6 = arith.constant 0 : index
    %c0_7 = arith.constant 0 : index
    %16 = vector.load %arg3[%c0_6, %c0_7] : memref<8x512xf32, #tpu.memory_space<vmem>>, vector<8x512xf32>
    tpu.vector_store %arg3[%c0_6, %c0_7], %15 {strides = array<i32>} : memref<8x512xf32, #tpu.memory_space<vmem>>, vector<8x512xf32>,
    return
  }
  func.func @transform_0(%arg0: i32) -> (i32, i32, i32) {
    %c0_i32 = arith.constant 0 : i32
    %c0_i32_0 = arith.constant 0 : i32
    %c0_i32_1 = arith.constant 0 : i32
    return %c0_i32, %c0_i32_0, %arg0 : i32, i32, i32
  }
  func.func @transform_1(%arg0: i32) -> (i32, i32) {
    %c0_i32 = arith.constant 0 : i32
    %c0_i32_0 = arith.constant 0 : i32
    %c0_i32_1 = arith.constant 0 : i32
    return %c0_i32, %c0_i32_0 : i32, i32
  }
  func.func @transform_2(%arg0: i32) -> (i32, i32) {
    %c0_i32 = arith.constant 0 : i32
    %c0_i32_0 = arith.constant 0 : i32
    return %c0_i32, %arg0 : i32, i32
  }
}

</mosaic_0001>

<bundles_post_ra>
// kernel: tpu_custom_call.1
= control target key start
LH: loop header
LB: loop body
LE: loop exit
PB: predicated region body
PF: predicated region fallthrough
CT: control target
= control target key end

     0   :  { %7 = vsyncpa [#allocation3], 0  ;;  %s3188_s0 = inlined_call_operand.hbm [shape: bf16[8,32,1024], index: 0, kind: input, shape index: {}]   ;;  %s3189_s1 = inlined_call_operand.vmem [shape: f32[32,1], index: 1, kind: input, shape index: {}]   ;;  %s3190_s2 = inlined_call_operand.hbm [shape: f32[8,1024], index: 2, kind: output, shape index: {}]  }
   0x1   :  { %9 = vsyncpa [#allocation3 + $0x1], 0 }
   0x2   :  { %10 = vsyncpa [#allocation4], 0 }
   0x3   :  { %12 = vsyncpa [#allocation4 + $0x1], 0  ;;  %s1535_s9 = smov 0   ;;  %s1537_s10 = smov 0  }
   0x4   :  { %s1539_s11 = smov 0   ;;  %s1541_s12 = smov 0  }
   0x5 LB: > { %s1556_s13 = sadd.s32 4294967295, %s1512_s12   ;;  %s1276_s14 = sadd.s32 4294967294, %s1512_s12   ;;  %s1512_s12 = sphi %s1541_s12, %s3552_s12   ;;  %s1508_s11 = sphi %s1539_s11, %s3551_s11   ;;  %s1504_s10 = sphi %s1537_s10, %s3550_s10   ;;  %s1500_s9 = sphi %s1535_s9, %s3549_s9  }
   0x6   : > { %s1560_s15 = sadd.s32 1, %s1512_s12   ;;  %s25_s16 = sadd.s32 1, %s1508_s11 }
   0x7   : > { %s22_s17 = ssub.s32 %s1512_s12, %s1560_s15  ;;  %p32_p0 = scmp.ne.s32.totalorder %s1508_s11, %s1504_s10 }
   0x8   : > { %p23_p1 = scmp.eq.s32.totalorder %s22_s17, 0  ;;  %p33_p2 = scmp.eq.s32.totalorder %s1512_s12, 0 }
   0x9   : > { %p38_p3 = scmp.ne.s32.totalorder %s1504_s10, %s1500_s9  ;;  %p39_p4 = scmp.eq.s32.totalorder %s1556_s13, 0 }
   0xa   : > { %s1572_s18 = scalar_select %p23_p1, %s1508_s11, %s25_s16  }
   0xb   : > { %p1574_p5 = por %p33_p2, %p32_p0  ;;  %p1578_p6 = por %p39_p4, %p38_p3 }
   0xc   : > { %p83_p7 = scmp.eq.s32.totalorder %s1556_s13, 1  ;;  %p89_p8 = scmp.eq.s32.totalorder %s1276_s14, 1 }
   0xd   : > { %p1304_p10 = scmp.lt.s32.totalorder %s1512_s12, 2  ;;  %s112_s23 = sand.u32 1, %s1508_s11  }
   0xe   : > { %p1585_p11 = por %p83_p7, %p32_p0  ;;  %p1589_p12 = por %p89_p8, %p38_p3 }
   0xf   : > { %s1290_s24 = sshll.u32 %s1512_s12, 8  ;;  %s1279_s25 = sshll.u32 %s112_s23, 9 }
  0x10   : > { %s3234_s21 = scalar_select %p1585_p11, 1, 0 }
  0x11   : > { %s3235_s22 = scalar_select %p1589_p12, 1, 0 }
  0x12   : > { %s1598_s28 = scalar_lea.hbm %s3188_s0, %s1290_s24  ;;  %s116_s29 = scalar_lea.vmem [#allocation2], %s1279_s25 }
  0x13   : > { %s123_s30 = sshll.u32 %s116_s29, 4  ;;  %p1602_p13 = pnand %p1304_p10, %p1574_p5  ;;  %s1606_s30 = int_to_ptr.vmem [resolvable:$true] %s123_s30 }
  0x14   : > { %s1609_s4 = scalar_lea.sflag [#allocation3], %s112_s23  ;;  %s1416_s5 = scalar_lea.hbm %s1598_s28, 8192 }
  0x15   : > { %p1417_p1 = scmp.ne.s32.totalorder %s1598_s28, %s1416_s5  ;;  %p1418_p2 = pneg %p1602_p13 }
  0x16   : > { %s1421_s8 = scalar_lea.hbm %s3188_s0, 16384  ;;  %p1422_p5 = scmp.lt.u32.totalorder %s1598_s28, %s3188_s0 }
  0x17   : > { %p1419_p3 = pnand %p1418_p2, %p1417_p1  ;;  %p1423_p7 = scmp.lt.u32.totalorder %s1421_s8, %s1416_s5 }
  0x18   : > { %p1425_p10 = scmp.lt.u32.totalorder %s1416_s5, %s1598_s28 }
  0x19   : > { %p1420_p4 = pneg %p1419_p3  ;;  %p1424_p8 = por %p1423_p7, %p1422_p5 }
  0x1b   : > { %p1426_p9 = por %p1425_p10, %p1424_p8 }
  0x1d   : > { %p1427_p0 = pnand %p1426_p9, %p1420_p4 }
  0x1f   : > { %1430 = shalt.err (!%p1427_p0)
}
  0x20   : > { %s1431_s17 = scalar_lea.vmem %s1606_s30, 8192  ;;  %s1514_s19 = smov [#allocation2]  }
  0x21   : > { %p1432_p1 = scmp.ne.s32.totalorder %s1606_s30, %s1431_s17  ;;  %s1436_s23 = sshll.u32 %s1514_s19, 4  ;;  %s1437_s23 = int_to_ptr.vmem [resolvable:$false] %s1436_s23 }
  0x22   : > { %s1438_s24 = scalar_lea.vmem %s1437_s23, 16384  ;;  %p1439_p11 = scmp.lt.s32.totalorder %s1606_s30, %s1437_s23 }
  0x23   : > { %p1434_p3 = pnand %p1432_p1, %p1418_p2  ;;  %p1440_p5 = scmp.lt.s32.totalorder %s1438_s24, %s1431_s17 }
  0x25   : > { %p1435_p12 = pneg %p1434_p3  ;;  %p1441_p7 = por %p1440_p5, %p1439_p11 }
  0x27   : > { %p1442_p8 = pnand %p1441_p7, %p1435_p12 }
  0x29   : > { %1445 = shalt.err (!%p1442_p8)
}
  0x2a   : > { %s1515_s25 = smov 512   ;;  %s1516_s26 = smov 256  }
  0x2b   : > { %s1517_s27 = smov 16   ;;  %p131_p9 = scmp.lt.s32.totalorder %s1512_s12, 3 }
  0x2c   : > { %1299 = dma.hbm_to_vmem [thread:$0]  (!%p1602_p13), %s1598_s28, 8192, %s1606_s30, %s1609_s4, %s1515_s25, %s1516_s26, %s1517_s27  }
  0x2d   : > { %p3237_p0 = scmp.ge.s32.totalorder %s1512_s12, 1 }
  0x2f   : > { %p132_p2 = pnand %p3237_p0, %p131_p9 }
  0x31   : > { %135 = sbr.rel (%p132_p2) target bundleno = 449 (0x1c1), region = 28 }
  0x38   : > { %s1641_s29 = sand.u32 1, %s1504_s10  }
  0x39   : > { %s1283_s5 = sshll.u32 %s1641_s29, 9  ;;  %s138_s6 = scalar_lea.sflag [#allocation3], %s1641_s29 }
  0x3a   : > { %s1645_s7 = scalar_lea.vmem [#allocation2], %s1283_s5 }
  0x3b   : > { %1491 = dma.done.wait (%p1578_p6), %s138_s6, 8192  }
  0x3c   : > { %1493 = vsyncadd (%p1578_p6), %s138_s6, 4294959104  ;;  %v1518_v0 = vmov 0   ;;  %v358_v1 = vld [vmem:[%s3189_s1 + $0x10] sm:$0xff]  ;;  %v356_v2 = vld [vmem:[%s3189_s1] sm:$0xff]  ;;  %vm953_vm0 = vcmask 1041409   ;;  %vm956_vm1 = vcmask 1042434  }
  0x3d   : > { %1343 = vset.pattern.permute.xlu1 %v1518_v0  ;;  %1342 = vset.pattern.permute.xlu0 %v1518_v0  ;;  %v359_v3 = vld [vmem:[%s3189_s1 + $0x18] sm:$0xff]  ;;  %v357_v4 = vld [vmem:[%s3189_s1 + $0x8] sm:$0xff]  ;;  %v1664_v5 = vld [vmem:[%s1645_s7] sm:$0xff]  ;;  %vm959_vm2 = vcmask 1043459   ;;  %vm962_vm3 = vcmask 1044484   ;;  %vm965_vm4 = vcmask 1045509  }
  0x3e   : > { %372 = vperm.xlu1 %1343, %v358_v1   ;;  %362 = vperm.xlu0 %1342, %v356_v2   ;;  %v1667_v6 = vld [vmem:[%s1645_s7 + $0x8] sm:$0xff]  ;;  %v1670_v7 = vld [vmem:[%s1645_s7 + $0x10] sm:$0xff]  ;;  %v1673_v8 = vld [vmem:[%s1645_s7 + $0x18] sm:$0xff]  ;;  %vm968_vm5 = vcmask 1046534   ;;  %vm971_vm6 = vcmask 1047559   ;;  %s1284_s17 = sshll.u32 %s1641_s29, 5 }
  0x3f   : > { %v1676_v9 = vld [vmem:[%s1645_s7 + $0x20] sm:$0xff]  ;;  %v1679_v10 = vld [vmem:[%s1645_s7 + $0x28] sm:$0xff]  ;;  %v1682_v11 = vld [vmem:[%s1645_s7 + $0x30] sm:$0xff]  ;;  %s161_s19 = scalar_lea.vmem [#allocation5], %s1284_s17  ;;  %s1291_s23 = sshll.u32 %s1556_s13, 9 }
  0x40   : > { %v1687_v14 = vld [vmem:[%s1645_s7 + $0x38] sm:$0xff]  ;;  %v1690_v15 = vld [vmem:[%s1645_s7 + $0x40] sm:$0xff]  ;;  %v1697_v20 = vld [vmem:[%s1645_s7 + $0x48] sm:$0xff]  ;;  %s1206_s24 = sshll.u32 %s161_s19, 4  ;;  %s3143_s27 = scalar_lea.hbm %s3190_s2, %s1291_s23  ;;  %s3145_s24 = int_to_ptr.vmem [resolvable:$true] %s1206_s24 }
  0x41   : > { %v1700_v21 = vld [vmem:[%s1645_s7 + $0x50] sm:$0xff]  ;;  %v1707_v26 = vld [vmem:[%s1645_s7 + $0x58] sm:$0xff]  ;;  %v1710_v27 = vld [vmem:[%s1645_s7 + $0x60] sm:$0xff]  ;;  %s1192_s13 = scalar_lea.sflag [#allocation4], %s1641_s29  ;;  %s1446_s5 = scalar_lea.vmem %s3145_s24, 512 }
  0x42   : > { %377 = vperm.xlu1 %1343, %v359_v3   ;;  %367 = vperm.xlu0 %1342, %v357_v4   ;;  %v1717_v32 = vld [vmem:[%s1645_s7 + $0x68] sm:$0xff]  ;;  %v1720_v33 = vld [vmem:[%s1645_s7 + $0x70] sm:$0xff]  ;;  %v1727_v38 = vld [vmem:[%s1645_s7 + $0x78] sm:$0xff]  ;;  %p1447_p6 = scmp.ne.s32.totalorder %s3145_s24, %s1446_s5  ;;  %p3546_p11 = scmp.ne.s32.totalorder %s3234_s21, 0 }
  0x43   : > { %v1730_v39 = vld [vmem:[%s1645_s7 + $0x80] sm:$0xff]  ;;  %v1737_v44 = vld [vmem:[%s1645_s7 + $0x88] sm:$0xff]  ;;  %v1740_v45 = vld [vmem:[%s1645_s7 + $0x90] sm:$0xff]  ;;  %s1519_s6 = smov [#allocation5]  }
  0x44   : > { %v1747_v50 = vld [vmem:[%s1645_s7 + $0x98] sm:$0xff]  ;;  %v1750_v51 = vld [vmem:[%s1645_s7 + $0xa0] sm:$0xff]  ;;  %v1757_v56 = vld [vmem:[%s1645_s7 + $0xa8] sm:$0xff]  ;;  %p1448_p12 = pnand %p1447_p6, %p3546_p11 }
  0x45   : > { %v1760_v57 = vld [vmem:[%s1645_s7 + $0xb0] sm:$0xff]  ;;  %v1767_v62 = vld [vmem:[%s1645_s7 + $0xb8] sm:$0xff]  ;;  %v1770_v63 = vld [vmem:[%s1645_s7 + $0xc0] sm:$0xff] }
  0x46   : > { %v1777_v4 = vld [vmem:[%s1645_s7 + $0xc8] sm:$0xff]  ;;  %v1780_v59 = vld [vmem:[%s1645_s7 + $0xd0] sm:$0xff]  ;;  %v1787_v1 = vld [vmem:[%s1645_s7 + $0xd8] sm:$0xff]  ;;  %p1449_p13 = pneg %p1448_p12 }
  0x47   : > { %v1790_v55 = vld [vmem:[%s1645_s7 + $0xe0] sm:$0xff]  ;;  %v1797_v60 = vld [vmem:[%s1645_s7 + $0xe8] sm:$0xff]  ;;  %v1800_v47 = vld [vmem:[%s1645_s7 + $0xf0] sm:$0xff] }
  0x48   : > { %v1807_v2 = vld [vmem:[%s1645_s7 + $0xf8] sm:$0xff]  ;;  %v1810_v43 = vld [vmem:[%s1645_s7 + $0x100] sm:$0xff]  ;;  %v1817_v0 = vld [vmem:[%s1645_s7 + $0x108] sm:$0xff] }
  0x49   : > { %v1820_v35 = vld [vmem:[%s1645_s7 + $0x110] sm:$0xff]  ;;  %v1827_v61 = vld [vmem:[%s1645_s7 + $0x118] sm:$0xff]  ;;  %v1830_v31 = vld [vmem:[%s1645_s7 + $0x120] sm:$0xff] }
  0x4a   : > { %v1837_v3 = vld [vmem:[%s1645_s7 + $0x128] sm:$0xff]  ;;  %v1840_v23 = vld [vmem:[%s1645_s7 + $0x130] sm:$0xff]  ;;  %v1847_v58 = vld [vmem:[%s1645_s7 + $0x138] sm:$0xff] }
  0x4b   : > { %v1850_v53 = vld [vmem:[%s1645_s7 + $0x140] sm:$0xff]  ;;  %v1857_v54 = vld [vmem:[%s1645_s7 + $0x148] sm:$0xff]  ;;  %v1860_v19 = vld [vmem:[%s1645_s7 + $0x150] sm:$0xff] }
  0x4c   : > { %v1867_v46 = vld [vmem:[%s1645_s7 + $0x158] sm:$0xff]  ;;  %v1870_v49 = vld [vmem:[%s1645_s7 + $0x160] sm:$0xff]  ;;  %v1877_v42 = vld [vmem:[%s1645_s7 + $0x168] sm:$0xff] }
  0x4d   : > { %3238 = vst [vmem:[#allocation8_spill] sm:$0xff] %v1870_v49  ;;  %3239 = vst [vmem:[#allocation9_spill] sm:$0xff] %v1877_v42  ;;  %v1880_v41 = vld [vmem:[%s1645_s7 + $0x170] sm:$0xff]  ;;  %v1887_v34 = vld [vmem:[%s1645_s7 + $0x178] sm:$0xff] }
  0x4e   : > { %3240 = vst [vmem:[#allocation10_spill] sm:$0xff] %v1880_v41  ;;  %3241 = vst [vmem:[#allocation11_spill] sm:$0xff] %v1887_v34  ;;  %v1890_v37 = vld [vmem:[%s1645_s7 + $0x180] sm:$0xff]  ;;  %v1897_v30 = vld [vmem:[%s1645_s7 + $0x188] sm:$0xff]  ;;  %v3260_v41 = vunpack.c.l.bf16 %v1667_v6 }
  0x4f   : > { %3242 = vst [vmem:[#allocation12_spill] sm:$0xff] %v1890_v37  ;;  %3243 = vst [vmem:[#allocation13_spill] sm:$0xff] %v1897_v30  ;;  %v1900_v29 = vld [vmem:[%s1645_s7 + $0x190] sm:$0xff]  ;;  %v1907_v22 = vld [vmem:[%s1645_s7 + $0x198] sm:$0xff] }
  0x50   : > { %3244 = vst [vmem:[#allocation14_spill] sm:$0xff] %v1900_v29  ;;  %3245 = vst [vmem:[#allocation15_spill] sm:$0xff] %v1907_v22  ;;  %v1910_v25 = vld [vmem:[%s1645_s7 + $0x1a0] sm:$0xff]  ;;  %v1917_v52 = vld [vmem:[%s1645_s7 + $0x1a8] sm:$0xff]  ;;  %v3261_v29 = vunpack.c.h.bf16 %v1667_v6  ;;  %v3265_v6 = vunpack.c.h.bf16 %v1679_v10 }
  0x51   : > { %3246 = vst [vmem:[#allocation16_spill] sm:$0xff] %v1910_v25  ;;  %3247 = vst [vmem:[#allocation17_spill] sm:$0xff] %v1917_v52  ;;  %v1920_v17 = vld [vmem:[%s1645_s7 + $0x1b0] sm:$0xff]  ;;  %v1927_v18 = vld [vmem:[%s1645_s7 + $0x1b8] sm:$0xff]  ;;  %v3258_v52 = vunpack.c.l.bf16 %v1664_v5  ;;  %v3259_v25 = vunpack.c.h.bf16 %v1664_v5  ;;  %v3263_v5 = vunpack.c.h.bf16 %v1676_v9 }
  0x52   : > { %3248 = vst [vmem:[#allocation18_spill] sm:$0xff] %v1920_v17  ;;  %3249 = vst [vmem:[#allocation19_spill] sm:$0xff] %v1927_v18  ;;  %v1930_v13 = vld [vmem:[%s1645_s7 + $0x1c0] sm:$0xff]  ;;  %v1937_v48 = vld [vmem:[%s1645_s7 + $0x1c8] sm:$0xff]  ;;  %v3279_v18 = vunpack.c.l.bf16 %v1673_v8 }
  0x53   : > { %3250 = vst [vmem:[#allocation20_spill] sm:$0xff] %v1930_v13  ;;  %3251 = vst [vmem:[#allocation21_spill] sm:$0xff] %v1937_v48  ;;  %v1940_v16 = vld [vmem:[%s1645_s7 + $0x1d0] sm:$0xff]  ;;  %v1949_v12 = vld [vmem:[%s1645_s7 + $0x1d8] sm:$0xff]  ;;  %v3275_v48 = vunpack.c.l.bf16 %v1717_v32 }
  0x54   : > { %3252 = vst [vmem:[#allocation22_spill] sm:$0xff] %v1940_v16  ;;  %3253 = vst [vmem:[#allocation23_spill] sm:$0xff] %v1949_v12  ;;  %v1952_v30 = vld [vmem:[%s1645_s7 + $0x1e0] sm:$0xff]  ;;  %v1961_v34 = vld [vmem:[%s1645_s7 + $0x1e8] sm:$0xff]  ;;  %v3270_v12 = vunpack.c.l.bf16 %v1710_v27  ;;  %v3273_v16 = vunpack.c.l.bf16 %v1670_v7 }
  0x55   : > { %3254 = vst [vmem:[#allocation24_spill] sm:$0xff] %v1952_v30  ;;  %3255 = vst [vmem:[#allocation25_spill] sm:$0xff] %v1961_v34  ;;  %v1964_v22 = vld [vmem:[%s1645_s7 + $0x1f0] sm:$0xff]  ;;  %v1971_v49 = vld [vmem:[%s1645_s7 + $0x1f8] sm:$0xff]  ;;  %v3268_v30 = vunpack.c.l.bf16 %v1697_v20  ;;  %s1450_s7 = sshll.u32 %s1519_s6, 4  ;;  %s1451_s7 = int_to_ptr.vmem [resolvable:$false] %s1450_s7 }
  0x56   : > { %3256 = vst [vmem:[#allocation26_spill] sm:$0xff] %v1964_v22  ;;  %3257 = vst [vmem:[#allocation27_spill] sm:$0xff] %v1971_v49  ;;  %s1452_s28 = scalar_lea.vmem %s1451_s7, 1024  ;;  %p1453_p4 = scmp.lt.s32.totalorder %s3145_s24, %s1451_s7 }
  0x57   : > { %p1454_p10 = scmp.lt.s32.totalorder %s1452_s28, %s1446_s5 }
  0x59   : > { %p1455_p1 = por %p1454_p10, %p1453_p4 }
  0x5b   : > { %p1456_p3 = pnand %p1455_p1, %p1449_p13 }
  0xbd   : > { %v1946_v40 = vpop.permute.xlu0 %362  ;;  %v1958_v37 = vpop.permute.xlu1 %372 }
  0xbe   : > { %v1990_v24 = vmul.f32 %v1946_v40, %v3258_v52  ;;  %v1995_v42 = vmul.f32 %v1946_v40, %v3259_v25  ;;  %v2002_v36 = vmul.f32 %v1946_v40, %v3260_v41  ;;  %v2007_v17 = vmul.f32 %v1946_v40, %v3261_v29 }
  0xbf   : > { %v3262_v52 = vunpack.c.l.bf16 %v1676_v9  ;;  %v2017_v25 = vmul.f32 %v1958_v37, %v3263_v5  ;;  %v3264_v41 = vunpack.c.l.bf16 %v1679_v10  ;;  %v2029_v29 = vmul.f32 %v1958_v37, %v3265_v6 }
  0xc0   : > { %v3267_v9 = vunpack.c.h.bf16 %v1690_v15  ;;  %v3269_v10 = vunpack.c.h.bf16 %v1697_v20  ;;  %v3274_v20 = vunpack.c.h.bf16 %v1670_v7  ;;  %v3280_v7 = vunpack.c.h.bf16 %v1673_v8 }
  0xc1   : > { %v1997_v28 = vpop.permute.xlu0 %367  ;;  %v2012_v13 = vmul.f32 %v1958_v37, %v3262_v52  ;;  %v2019_v49 = vpop.permute.xlu1 %377  ;;  %v2024_v22 = vmul.f32 %v1958_v37, %v3264_v41  ;;  %v3266_v52 = vunpack.c.l.bf16 %v1690_v15  ;;  %v2044_v41 = vmul.f32 %v1946_v40, %v3268_v30 }
  0xc2   : > { %v2039_v5 = vmul.f32 %v1946_v40, %v3267_v9  ;;  %v2049_v6 = vmul.f32 %v1946_v40, %v3269_v10  ;;  %v3271_v15 = vunpack.c.h.bf16 %v1710_v27  ;;  %v2064_v30 = vmul.f32 %v1997_v28, %v3273_v16 }
  0xc3   : > { %v2034_v34 = vmul.f32 %v1946_v40, %v3266_v52  ;;  %v2054_v52 = vmul.f32 %v1958_v37, %v3270_v12  ;;  %v2069_v10 = vmul.f32 %v1997_v28, %v3274_v20  ;;  %v2074_v12 = vmul.f32 %v1958_v37, %v3275_v48 }
  0xc4   : > { %v2059_v9 = vmul.f32 %v1958_v37, %v3271_v15  ;;  %v3277_v27 = vunpack.c.h.bf16 %v1717_v32  ;;  %v2084_v16 = vmul.f32 %v1997_v28, %v3279_v18  ;;  %v2089_v20 = vmul.f32 %v1997_v28, %v3280_v7 }
  0xc5   : > { %3276 = vst [vmem:[#allocation29_spill] sm:$0xff] %v2074_v12  ;;  %v3283_v32 = vunpack.c.h.bf16 %v1682_v11  ;;  %v3287_v8 = vunpack.c.h.bf16 %v1687_v14  ;;  %v3289_v12 = vunpack.c.l.bf16 %v1700_v21 }
  0xc6   : > { %3272 = vst [vmem:[#allocation28_spill] sm:$0xff] %v2059_v9  ;;  %v2079_v15 = vmul.f32 %v1958_v37, %v3277_v27  ;;  %v3281_v9 = vunpack.c.l.bf16 %v1682_v11  ;;  %v3290_v11 = vunpack.c.h.bf16 %v1700_v21  ;;  %v3294_v21 = vunpack.c.h.bf16 %v1720_v33 }
  0xc7   : > { %v2099_v27 = vmul.f32 %v2019_v49, %v3283_v32  ;;  %v2109_v7 = vmul.f32 %v2019_v49, %v3287_v8 }
  0xc8   : > { %3278 = vst [vmem:[#allocation30_spill] sm:$0xff] %v2079_v15  ;;  %v2094_v48 = vmul.f32 %v2019_v49, %v3281_v9  ;;  %v3285_v15 = vunpack.c.l.bf16 %v1687_v14  ;;  %v2114_v9 = vmul.f32 %v1997_v28, %v3289_v12  ;;  %v2119_v32 = vmul.f32 %v1997_v28, %v3290_v11 }
  0xc9   : > { %3284 = vst [vmem:[#allocation32_spill] sm:$0xff] %v2099_v27  ;;  %3288 = vst [vmem:[#allocation34_spill] sm:$0xff] %v2109_v7  ;;  %v3291_v27 = vunpack.c.l.bf16 %v1707_v26  ;;  %v3292_v14 = vunpack.c.h.bf16 %v1707_v26  ;;  %v3293_v7 = vunpack.c.l.bf16 %v1720_v33  ;;  %v2139_v11 = vmul.f32 %v2019_v49, %v3294_v21 }
  0xca   : > { %3282 = vst [vmem:[#allocation31_spill] sm:$0xff] %v2094_v48  ;;  %v2104_v18 = vmul.f32 %v2019_v49, %v3285_v15  ;;  %v3297_v26 = vunpack.c.h.bf16 %v1727_v38  ;;  %v3299_v48 = vunpack.c.l.bf16 %v1730_v39  ;;  %v3300_v33 = vunpack.c.h.bf16 %v1730_v39 }
  0xcb   : > { %v2124_v15 = vmul.f32 %v1997_v28, %v3291_v27  ;;  %v2129_v8 = vmul.f32 %v1997_v28, %v3292_v14  ;;  %v2134_v12 = vmul.f32 %v2019_v49, %v3293_v7  ;;  %3295 = vst [vmem:[#allocation35_spill] sm:$0xff] %v2139_v11  ;;  %v3302_v11 = vunpack.c.l.bf16 %v1737_v44 }
  0xcc   : > { %3286 = vst [vmem:[#allocation33_spill] sm:$0xff] %v2104_v18  ;;  %v3296_v18 = vunpack.c.l.bf16 %v1727_v38  ;;  %v2149_v14 = vmul.f32 %v2019_v49, %v3297_v26  ;;  %v2154_v7 = vmul.f32 %v1946_v40, %v3299_v48  ;;  %v2159_v21 = vmul.f32 %v1946_v40, %v3300_v33 }
  0xcd   : > { %v3304_v38 = vunpack.c.h.bf16 %v1737_v44  ;;  %v3307_v39 = vunpack.c.h.bf16 %v1740_v45  ;;  %v3309_v44 = vunpack.c.h.bf16 %v1747_v50 }
  0xce   : > { %v2144_v27 = vmul.f32 %v2019_v49, %v3296_v18  ;;  %3298 = vst [vmem:[#allocation36_spill] sm:$0xff] %v2149_v14  ;;  %3301 = vst [vmem:[#allocation37_spill] sm:$0xff] %v2159_v21  ;;  %v2164_v18 = vmul.f32 %v1946_v40, %v3302_v11  ;;  %v3306_v14 = vunpack.c.l.bf16 %v1740_v45  ;;  %v3308_v21 = vunpack.c.l.bf16 %v1747_v50 }
  0xcf   : > { %v2169_v26 = vmul.f32 %v1946_v40, %v3304_v38  ;;  %v2179_v33 = vmul.f32 %v1997_v28, %v3307_v39  ;;  %v2189_v38 = vmul.f32 %v1997_v28, %v3309_v44  ;;  %v3313_v45 = vunpack.c.h.bf16 %v1750_v51 }
  0xd0   : > { %3303 = vst [vmem:[#allocation38_spill] sm:$0xff] %v2164_v18  ;;  %v2174_v48 = vmul.f32 %v1997_v28, %v3306_v14  ;;  %v2184_v11 = vmul.f32 %v1997_v28, %v3308_v21  ;;  %v3315_v18 = vunpack.c.l.bf16 %v1757_v56  ;;  %v3317_v50 = vunpack.c.h.bf16 %v1757_v56 }
  0xd1   : > { %3305 = vst [vmem:[#allocation39_spill] sm:$0xff] %v2169_v26  ;;  %3310 = vst [vmem:[#allocation40_spill] sm:$0xff] %v2189_v38  ;;  %v3311_v26 = vunpack.c.l.bf16 %v1750_v51  ;;  %v2199_v39 = vmul.f32 %v1958_v37, %v3313_v45  ;;  %v3319_v38 = vunpack.c.l.bf16 %v1760_v57  ;;  %v3321_v51 = vunpack.c.h.bf16 %v1760_v57 }
  0xd2   : > { %v2204_v21 = vmul.f32 %v1958_v37, %v3315_v18  ;;  %v2209_v44 = vmul.f32 %v1958_v37, %v3317_v50  ;;  %v3325_v56 = vunpack.c.h.bf16 %v1767_v62  ;;  %v3328_v57 = vunpack.c.h.bf16 %v1770_v63 }
  0xd3   : > { %v2194_v14 = vmul.f32 %v1958_v37, %v3311_v26  ;;  %3314 = vst [vmem:[#allocation42_spill] sm:$0xff] %v2199_v39  ;;  %v2214_v26 = vmul.f32 %v2019_v49, %v3319_v38  ;;  %v2219_v45 = vmul.f32 %v2019_v49, %v3321_v51  ;;  %v3323_v39 = vunpack.c.l.bf16 %v1767_v62 }
  0xd4   : > { %3316 = vst [vmem:[#allocation43_spill] sm:$0xff] %v2204_v21  ;;  %3318 = vst [vmem:[#allocation44_spill] sm:$0xff] %v2209_v44  ;;  %v2229_v50 = vmul.f32 %v2019_v49, %v3325_v56  ;;  %v3327_v44 = vunpack.c.l.bf16 %v1770_v63  ;;  %v2239_v51 = vmul.f32 %v1946_v40, %v3328_v57  ;;  %v3330_v62 = vunpack.c.h.bf16 %v1777_v4 }
  0xd5   : > { %3312 = vst [vmem:[#allocation41_spill] sm:$0xff] %v2194_v14  ;;  %3320 = vst [vmem:[#allocation45_spill] sm:$0xff] %v2214_v26  ;;  %v2224_v18 = vmul.f32 %v2019_v49, %v3323_v39  ;;  %v3332_v63 = vunpack.c.h.bf16 %v1780_v59  ;;  %v3335_v26 = vunpack.c.l.bf16 %v1790_v55  ;;  %v3338_v21 = vunpack.c.l.bf16 %v1797_v60 }
  0xd6   : > { %3322 = vst [vmem:[#allocation46_spill] sm:$0xff] %v2219_v45  ;;  %3326 = vst [vmem:[#allocation48_spill] sm:$0xff] %v2229_v50  ;;  %v2234_v38 = vmul.f32 %v1946_v40, %v3327_v44  ;;  %v3329_v45 = vunpack.c.l.bf16 %v1777_v4  ;;  %v2249_v56 = vmul.f32 %v1946_v40, %v3330_v62  ;;  %v3331_v50 = vunpack.c.l.bf16 %v1780_v59 }
  0xd7   : > { %3324 = vst [vmem:[#allocation47_spill] sm:$0xff] %v2224_v18  ;;  %v2259_v57 = vmul.f32 %v1997_v28, %v3332_v63  ;;  %v3333_v18 = vunpack.c.l.bf16 %v1787_v1  ;;  %v3334_v4 = vunpack.c.h.bf16 %v1787_v1  ;;  %v3336_v59 = vunpack.c.h.bf16 %v1790_v55 }
  0xd8   : > { %v2244_v39 = vmul.f32 %v1946_v40, %v3329_v45  ;;  %v2254_v44 = vmul.f32 %v1997_v28, %v3331_v50  ;;  %v2274_v50 = vmul.f32 %v1958_v37, %v3335_v26  ;;  %v3339_v1 = vunpack.c.h.bf16 %v1797_v60 }
  0xd9   : > { %v2264_v45 = vmul.f32 %v1997_v28, %v3333_v18  ;;  %v2269_v62 = vmul.f32 %v1997_v28, %v3334_v4  ;;  %v2279_v63 = vmul.f32 %v1958_v37, %v3336_v59  ;;  %v2284_v18 = vmul.f32 %v1958_v37, %v3338_v21 }
  0xda   : > { %v2289_v4 = vmul.f32 %v1958_v37, %v3339_v1  ;;  %v3341_v14 = vunpack.c.l.bf16 %v1800_v47  ;;  %v3342_v55 = vunpack.c.h.bf16 %v1800_v47  ;;  %v3345_v60 = vunpack.c.h.bf16 %v1807_v2 }
  0xdb   : > { %3337 = vst [vmem:[#allocation49_spill] sm:$0xff] %v2279_v63  ;;  %v3344_v63 = vunpack.c.l.bf16 %v1807_v2  ;;  %v3348_v47 = vunpack.c.h.bf16 %v1810_v43  ;;  %v3352_v2 = vunpack.c.h.bf16 %v1817_v0 }
  0xdc   : > { %3340 = vst [vmem:[#allocation50_spill] sm:$0xff] %v2289_v4  ;;  %v2294_v26 = vmul.f32 %v2019_v49, %v3341_v14  ;;  %v2299_v59 = vmul.f32 %v2019_v49, %v3342_v55  ;;  %v2309_v1 = vmul.f32 %v2019_v49, %v3345_v60  ;;  %v3347_v4 = vunpack.c.l.bf16 %v1810_v43 }
  0xdd   : > { %v2304_v21 = vmul.f32 %v2019_v49, %v3344_v63  ;;  %v2319_v55 = vmul.f32 %v1946_v40, %v3348_v47  ;;  %v2329_v60 = vmul.f32 %v1946_v40, %v3352_v2  ;;  %v3355_v43 = vunpack.c.h.bf16 %v1820_v35 }
  0xde   : > { %3343 = vst [vmem:[#allocation51_spill] sm:$0xff] %v2299_v59  ;;  %3346 = vst [vmem:[#allocation52_spill] sm:$0xff] %v2309_v1  ;;  %v2314_v14 = vmul.f32 %v1946_v40, %v3347_v4  ;;  %v3350_v59 = vunpack.c.l.bf16 %v1817_v0  ;;  %v3354_v1 = vunpack.c.l.bf16 %v1820_v35  ;;  %v3357_v0 = vunpack.c.h.bf16 %v1827_v61 }
  0xdf   : > { %3349 = vst [vmem:[#allocation53_spill] sm:$0xff] %v2319_v55  ;;  %3353 = vst [vmem:[#allocation55_spill] sm:$0xff] %v2329_v60  ;;  %v2339_v47 = vmul.f32 %v1997_v28, %v3355_v43  ;;  %v3356_v55 = vunpack.c.l.bf16 %v1827_v61  ;;  %v3359_v60 = vunpack.c.l.bf16 %v1830_v31  ;;  %v3361_v35 = vunpack.c.h.bf16 %v1830_v31 }
  0xe0   : > { %v2324_v63 = vmul.f32 %v1946_v40, %v3350_v59  ;;  %v2334_v4 = vmul.f32 %v1997_v28, %v3354_v1  ;;  %v2349_v2 = vmul.f32 %v1997_v28, %v3357_v0  ;;  %v3365_v61 = vunpack.c.h.bf16 %v1837_v3 }
  0xe1   : > { %v2344_v59 = vmul.f32 %v1997_v28, %v3356_v55  ;;  %v2354_v1 = vmul.f32 %v1958_v37, %v3359_v60  ;;  %v2359_v43 = vmul.f32 %v1958_v37, %v3361_v35  ;;  %v3369_v31 = vunpack.c.h.bf16 %v1840_v23 }
  0xe2   : > { %3351 = vst [vmem:[#allocation54_spill] sm:$0xff] %v2324_v63  ;;  %3358 = vst [vmem:[#allocation56_spill] sm:$0xff] %v2349_v2  ;;  %v3363_v63 = vunpack.c.l.bf16 %v1837_v3  ;;  %v2369_v0 = vmul.f32 %v1958_v37, %v3365_v61  ;;  %v3367_v2 = vunpack.c.l.bf16 %v1840_v23  ;;  %v3373_v3 = vunpack.c.h.bf16 %v1847_v58 }
  0xe3   : > { %3360 = vst [vmem:[#allocation57_spill] sm:$0xff] %v2354_v1  ;;  %3362 = vst [vmem:[#allocation58_spill] sm:$0xff] %v2359_v43  ;;  %v2379_v35 = vmul.f32 %v2019_v49, %v3369_v31  ;;  %v3371_v43 = vunpack.c.l.bf16 %v1847_v58  ;;  %v3376_v23 = vunpack.c.h.bf16 %v1850_v53  ;;  %v3378_v58 = vunpack.c.h.bf16 %v1857_v54  ;;  %v3391_v1 = vld [vmem:[#allocation9_spill] sm:$0xff] }
  0xe4   : > { %v2364_v55 = vmul.f32 %v1958_v37, %v3363_v63  ;;  %3366 = vst [vmem:[#allocation60_spill] sm:$0xff] %v2369_v0  ;;  %v2374_v60 = vmul.f32 %v2019_v49, %v3367_v2  ;;  %v2389_v61 = vmul.f32 %v2019_v49, %v3373_v3  ;;  %v3375_v0 = vunpack.c.l.bf16 %v1850_v53 }
  0xe5   : > { %3370 = vst [vmem:[#allocation62_spill] sm:$0xff] %v2379_v35  ;;  %v2384_v63 = vmul.f32 %v2019_v49, %v3371_v43  ;;  %v2399_v31 = vmul.f32 %v1946_v40, %v3376_v23  ;;  %v3377_v35 = vunpack.c.l.bf16 %v1857_v54  ;;  %v2409_v3 = vmul.f32 %v1946_v40, %v3378_v58 }
  0xe6   : > { %3364 = vst [vmem:[#allocation59_spill] sm:$0xff] %v2364_v55  ;;  %3368 = vst [vmem:[#allocation61_spill] sm:$0xff] %v2374_v60  ;;  %v2394_v2 = vmul.f32 %v1946_v40, %v3375_v0  ;;  %v3381_v53 = vunpack.c.h.bf16 %v1860_v19  ;;  %v3384_v54 = vunpack.c.h.bf16 %v1867_v46  ;;  %v3386_v60 = vld [vmem:[#allocation8_spill] sm:$0xff] }
  0xe7   : > { %3372 = vst [vmem:[#allocation63_spill] sm:$0xff] %v2384_v63  ;;  %3374 = vst [vmem:[#allocation64_spill] sm:$0xff] %v2389_v61  ;;  %v2404_v43 = vmul.f32 %v1946_v40, %v3377_v35  ;;  %v3380_v61 = vunpack.c.l.bf16 %v1860_v19  ;;  %v3382_v63 = vunpack.c.l.bf16 %v1867_v46  ;;  %v3387_v55 = vunpack.c.l.bf16 %v3386_v60 }
  0xe8   : > { %3379 = vst [vmem:[#allocation65_spill] sm:$0xff] %v2409_v3  ;;  %v2419_v23 = vmul.f32 %v1997_v28, %v3381_v53  ;;  %v2429_v58 = vmul.f32 %v1997_v28, %v3384_v54  ;;  %v3389_v19 = vunpack.c.h.bf16 %v3386_v60  ;;  %v3392_v3 = vunpack.c.l.bf16 %v3391_v1 }
  0xe9   : > { %v2414_v0 = vmul.f32 %v1997_v28, %v3380_v61  ;;  %v2424_v35 = vmul.f32 %v1997_v28, %v3382_v63  ;;  %v2434_v61 = vmul.f32 %v1958_v37, %v3387_v55  ;;  %v3394_v46 = vunpack.c.h.bf16 %v3391_v1 }
  0xea   : > { %3385 = vst [vmem:[#allocation67_spill] sm:$0xff] %v2429_v58  ;;  %v2439_v53 = vmul.f32 %v1958_v37, %v3389_v19  ;;  %v2444_v63 = vmul.f32 %v1958_v37, %v3392_v3  ;;  %v3396_v58 = vld [vmem:[#allocation10_spill] sm:$0xff] }
  0xeb   : > { %3383 = vst [vmem:[#allocation66_spill] sm:$0xff] %v2424_v35  ;;  %3388 = vst [vmem:[#allocation8_spill] sm:$0xff] %v2434_v61  ;;  %v2449_v54 = vmul.f32 %v1958_v37, %v3394_v46  ;;  %v3397_v35 = vunpack.c.l.bf16 %v3396_v58  ;;  %v3399_v60 = vunpack.c.h.bf16 %v3396_v58 }
  0xec   : > { %3390 = vst [vmem:[#allocation68_spill] sm:$0xff] %v2439_v53  ;;  %3393 = vst [vmem:[#allocation9_spill] sm:$0xff] %v2444_v63  ;;  %v3401_v53 = vld [vmem:[#allocation11_spill] sm:$0xff] }
  0xed   : > { %3395 = vst [vmem:[#allocation69_spill] sm:$0xff] %v2449_v54  ;;  %v2454_v55 = vmul.f32 %v2019_v49, %v3397_v35  ;;  %v2459_v19 = vmul.f32 %v2019_v49, %v3399_v60  ;;  %v3402_v61 = vunpack.c.l.bf16 %v3401_v53  ;;  %v3404_v1 = vunpack.c.h.bf16 %v3401_v53  ;;  %v3406_v54 = vld [vmem:[#allocation12_spill] sm:$0xff] }
  0xee   : > { %v3407_v63 = vunpack.c.l.bf16 %v3406_v54  ;;  %v3409_v58 = vunpack.c.h.bf16 %v3406_v54 }
  0xef   : > { %3398 = vst [vmem:[#allocation10_spill] sm:$0xff] %v2454_v55  ;;  %3400 = vst [vmem:[#allocation70_spill] sm:$0xff] %v2459_v19  ;;  %v2464_v3 = vmul.f32 %v2019_v49, %v3402_v61  ;;  %v2469_v46 = vmul.f32 %v2019_v49, %v3404_v1  ;;  %v3411_v19 = vld [vmem:[#allocation13_spill] sm:$0xff] }
  0xf0   : > { %v2474_v35 = vmul.f32 %v1946_v40, %v3407_v63  ;;  %v2479_v60 = vmul.f32 %v1946_v40, %v3409_v58  ;;  %v3412_v55 = vunpack.c.l.bf16 %v3411_v19  ;;  %v3414_v53 = vunpack.c.h.bf16 %v3411_v19 }
  0xf1   : > { %3403 = vst [vmem:[#allocation11_spill] sm:$0xff] %v2464_v3  ;;  %3405 = vst [vmem:[#allocation71_spill] sm:$0xff] %v2469_v46  ;;  %v3416_v46 = vld [vmem:[#allocation14_spill] sm:$0xff] }
  0xf2   : > { %3408 = vst [vmem:[#allocation12_spill] sm:$0xff] %v2474_v35  ;;  %3410 = vst [vmem:[#allocation72_spill] sm:$0xff] %v2479_v60  ;;  %v2484_v61 = vmul.f32 %v1946_v40, %v3412_v55  ;;  %v2489_v1 = vmul.f32 %v1946_v40, %v3414_v53  ;;  %v3417_v3 = vunpack.c.l.bf16 %v3416_v46  ;;  %v3418_v54 = vunpack.c.h.bf16 %v3416_v46  ;;  %v3420_v60 = vld [vmem:[#allocation15_spill] sm:$0xff] }
  0xf3   : > { %v3421_v35 = vunpack.c.l.bf16 %v3420_v60  ;;  %v3422_v19 = vunpack.c.h.bf16 %v3420_v60  ;;  %v526_v60 = vadd.f32 %v2084_v16, %v2002_v36 }
  0xf4   : > { %3413 = vst [vmem:[#allocation13_spill] sm:$0xff] %v2484_v61  ;;  %3415 = vst [vmem:[#allocation73_spill] sm:$0xff] %v2489_v1  ;;  %v2494_v63 = vmul.f32 %v1997_v28, %v3417_v3  ;;  %v2499_v58 = vmul.f32 %v1997_v28, %v3418_v54  ;;  %v3423_v1 = vld [vmem:[#allocation16_spill] sm:$0xff] }
  0xf5   : > { %v2504_v55 = vmul.f32 %v1997_v28, %v3421_v35  ;;  %v2509_v53 = vmul.f32 %v1997_v28, %v3422_v19  ;;  %v3424_v61 = vunpack.c.l.bf16 %v3423_v1  ;;  %v3426_v46 = vunpack.c.h.bf16 %v3423_v1 }
  0xf6   : > { %3419 = vst [vmem:[#allocation14_spill] sm:$0xff] %v2499_v58  ;;  %v508_v58 = vadd.f32 %v2064_v30, %v1990_v24  ;;  %v517_v35 = vadd.f32 %v2069_v10, %v1995_v42  ;;  %v535_v19 = vadd.f32 %v2089_v20, %v2007_v17  ;;  %v553_v1 = vadd.f32 %v2119_v32, %v2039_v5  ;;  %v3429_v20 = vld [vmem:[#allocation29_spill] sm:$0xff] }
  0xf7   : > { %v2514_v3 = vmul.f32 %v1958_v37, %v3424_v61  ;;  %v2519_v54 = vmul.f32 %v1958_v37, %v3426_v46  ;;  %v544_v61 = vadd.f32 %v2114_v9, %v2034_v34  ;;  %v562_v46 = vadd.f32 %v2124_v15, %v2044_v41  ;;  %v3428_v34 = vld [vmem:[#allocation28_spill] sm:$0xff]  ;;  %v3430_v9 = vld [vmem:[#allocation30_spill] sm:$0xff]  ;;  %v3431_v41 = vld [vmem:[#allocation31_spill] sm:$0xff] }
  0xf8   : > { %v571_v24 = vadd.f32 %v2129_v8, %v2049_v6  ;;  %v509_v42 = vadd.f32 %v508_v58, %v2012_v13  ;;  %v518_v30 = vadd.f32 %v517_v35, %v2017_v25  ;;  %v527_v36 = vadd.f32 %v526_v60, %v2024_v22  ;;  %v3433_v8 = vld [vmem:[#allocation33_spill] sm:$0xff]  ;;  %v3434_v58 = vld [vmem:[#allocation34_spill] sm:$0xff]  ;;  %v3435_v35 = vld [vmem:[#allocation35_spill] sm:$0xff] }
  0xf9   : > { %3425 = vst [vmem:[#allocation15_spill] sm:$0xff] %v2514_v3  ;;  %3427 = vst [vmem:[#allocation16_spill] sm:$0xff] %v2519_v54  ;;  %v536_v17 = vadd.f32 %v535_v19, %v2029_v29  ;;  %v545_v10 = vadd.f32 %v544_v61, %v2054_v52  ;;  %v554_v16 = vadd.f32 %v553_v1, %v3428_v34  ;;  %v3432_v54 = vld [vmem:[#allocation32_spill] sm:$0xff]  ;;  %v3437_v61 = vld [vmem:[#allocation17_spill] sm:$0xff] }
  0xfa   : > { %v563_v5 = vadd.f32 %v562_v46, %v3429_v20  ;;  %v572_v32 = vadd.f32 %v571_v24, %v3430_v9  ;;  %v510_v15 = vadd.f32 %v509_v42, %v3431_v41  ;;  %v519_v6 = vadd.f32 %v518_v30, %v3432_v54  ;;  %v3436_v60 = vld [vmem:[#allocation36_spill] sm:$0xff]  ;;  %v3447_v34 = vld [vmem:[#allocation19_spill] sm:$0xff] }
  0xfb   : > { %v528_v13 = vadd.f32 %v527_v36, %v3433_v8  ;;  %v537_v25 = vadd.f32 %v536_v17, %v3434_v58  ;;  %v546_v22 = vadd.f32 %v545_v10, %v2134_v12  ;;  %v555_v29 = vadd.f32 %v554_v16, %v3435_v35  ;;  %v3442_v36 = vld [vmem:[#allocation18_spill] sm:$0xff] }
  0xfc   : > { %v564_v52 = vadd.f32 %v563_v5, %v2144_v27  ;;  %v573_v19 = vadd.f32 %v572_v32, %v3436_v60  ;;  %v3438_v1 = vunpack.c.l.bf16 %v3437_v61  ;;  %v3440_v24 = vunpack.c.h.bf16 %v3437_v61 }
  0xfd   : > { %v511_v42 = vrot.slane %v510_v15, 4  ;;  %v520_v30 = vrot.slane %v519_v6, 4  ;;  %v3443_v12 = vunpack.c.l.bf16 %v3442_v36  ;;  %v3445_v27 = vunpack.c.h.bf16 %v3442_v36 }
  0xfe   : > { %v2556_v46 = vmul.f32 %v1958_v37, %v3438_v1  ;;  %v2561_v54 = vmul.f32 %v1958_v37, %v3440_v24  ;;  %v3448_v16 = vunpack.c.l.bf16 %v3447_v34  ;;  %v3450_v5 = vunpack.c.h.bf16 %v3447_v34  ;;  %v3452_v24 = vld [vmem:[#allocation20_spill] sm:$0xff] }
  0xff   : > { %v2566_v17 = vmul.f32 %v2019_v49, %v3443_v12  ;;  %v2571_v10 = vmul.f32 %v2019_v49, %v3445_v27  ;;  %v529_v32 = vrot.slane %v528_v13, 4  ;;  %v538_v41 = vrot.slane %v537_v25, 4 }
 0x100   : > { %3439 = vst [vmem:[#allocation28_spill] sm:$0xff] %v2556_v46  ;;  %3441 = vst [vmem:[#allocation29_spill] sm:$0xff] %v2561_v54  ;;  %v2576_v20 = vmul.f32 %v2019_v49, %v3448_v16  ;;  %v2581_v9 = vmul.f32 %v2019_v49, %v3450_v5  ;;  %v547_v8 = vrot.slane %v546_v22, 4  ;;  %v556_v58 = vrot.slane %v555_v29, 4  ;;  %v3455_v16 = vld [vmem:[#allocation21_spill] sm:$0xff] }
 0x101   : > { %3444 = vst [vmem:[#allocation30_spill] sm:$0xff] %v2566_v17  ;;  %3446 = vst [vmem:[#allocation31_spill] sm:$0xff] %v2571_v10  ;;  %v512_v35 = vadd.f32 %v511_v42, %v510_v15  ;;  %v521_v60 = vadd.f32 %v520_v30, %v519_v6  ;;  %v565_v61 = vrot.slane %v564_v52, 4  ;;  %v574_v1 = vrot.slane %v573_v19, 4  ;;  %v3460_v42 = vld [vmem:[#allocation22_spill] sm:$0xff] }
 0x102   : > { %3449 = vst [vmem:[#allocation32_spill] sm:$0xff] %v2576_v20  ;;  %3451 = vst [vmem:[#allocation33_spill] sm:$0xff] %v2581_v9  ;;  %v3453_v36 = vunpack.c.l.bf16 %v3452_v24  ;;  %v3454_v27 = vunpack.c.h.bf16 %v3452_v24  ;;  %v3456_v5 = vunpack.c.l.bf16 %v3455_v16  ;;  %v3458_v15 = vunpack.c.h.bf16 %v3455_v16  ;;  %v3464_v20 = vld [vmem:[#allocation23_spill] sm:$0xff] }
 0x103   : > { %v3461_v30 = vunpack.c.l.bf16 %v3460_v42  ;;  %v3462_v24 = vunpack.c.h.bf16 %v3460_v42  ;;  %v3465_v10 = vunpack.c.l.bf16 %v3464_v20  ;;  %v3466_v16 = vunpack.c.h.bf16 %v3464_v20 }
 0x104   : > { %v2586_v12 = vmul.f32 %v1946_v40, %v3453_v36  ;;  %v2591_v34 = vmul.f32 %v1946_v40, %v3454_v27  ;;  %v2596_v9 = vmul.f32 %v1946_v40, %v3456_v5  ;;  %v2601_v6 = vmul.f32 %v1946_v40, %v3458_v15 }
 0x105   : > { %v2606_v36 = vmul.f32 %v1997_v28, %v3461_v30  ;;  %v2611_v27 = vmul.f32 %v1997_v28, %v3462_v24  ;;  %v2616_v5 = vmul.f32 %v1997_v28, %v3465_v10  ;;  %v2621_v40 = vmul.f32 %v1997_v28, %v3466_v16  ;;  %v3467_v24 = vld [vmem:[#allocation24_spill] sm:$0xff]  ;;  %v3470_v28 = vld [vmem:[#allocation25_spill] sm:$0xff] }
 0x106   : > { %3457 = vst [vmem:[#allocation34_spill] sm:$0xff] %v2596_v9  ;;  %3459 = vst [vmem:[#allocation35_spill] sm:$0xff] %v2601_v6  ;;  %v530_v15 = vadd.f32 %v529_v32, %v528_v13  ;;  %v539_v17 = vadd.f32 %v538_v41, %v537_v25  ;;  %v548_v54 = vadd.f32 %v547_v8, %v546_v22  ;;  %v513_v46 = vrot.slane %v512_v35, 2  ;;  %v3480_v41 = vld [vmem:[#allocation27_spill] sm:$0xff] }
 0x107   : > { %3463 = vst [vmem:[#allocation36_spill] sm:$0xff] %v2611_v27  ;;  %v557_v30 = vadd.f32 %v556_v58, %v555_v29  ;;  %v522_v3 = vrot.slane %v521_v60, 2  ;;  %v566_v42 = vadd.f32 %v565_v61, %v564_v52  ;;  %v575_v6 = vadd.f32 %v574_v1, %v573_v19  ;;  %v3475_v29 = vld [vmem:[#allocation26_spill] sm:$0xff] }
 0x108   : > { %v3468_v9 = vunpack.c.l.bf16 %v3467_v24  ;;  %v3469_v10 = vunpack.c.h.bf16 %v3467_v24  ;;  %v3471_v16 = vunpack.c.l.bf16 %v3470_v28  ;;  %v3473_v25 = vunpack.c.h.bf16 %v3470_v28 }
 0x109   : > { %v3476_v52 = vunpack.c.l.bf16 %v3475_v29  ;;  %v3481_v8 = vunpack.c.l.bf16 %v3480_v41  ;;  %v3483_v61 = vunpack.c.h.bf16 %v3480_v41  ;;  %v531_v1 = vrot.slane %v530_v15, 2 }
 0x10a   : > { %v2626_v27 = vmul.f32 %v1958_v37, %v3468_v9  ;;  %v2631_v20 = vmul.f32 %v1958_v37, %v3469_v10  ;;  %v2636_v13 = vmul.f32 %v1958_v37, %v3471_v16  ;;  %v2641_v22 = vmul.f32 %v1958_v37, %v3473_v25 }
 0x10b   : > { %v2646_v19 = vmul.f32 %v2019_v49, %v3476_v52  ;;  %v3478_v9 = vunpack.c.h.bf16 %v3475_v29  ;;  %v2656_v58 = vmul.f32 %v2019_v49, %v3481_v8  ;;  %v2661_v37 = vmul.f32 %v2019_v49, %v3483_v61 }
 0x10c   : > { %3472 = vst [vmem:[#allocation17_spill] sm:$0xff] %v2636_v13  ;;  %3474 = vst [vmem:[#allocation18_spill] sm:$0xff] %v2641_v22  ;;  %v540_v24 = vrot.slane %v539_v17, 2  ;;  %v549_v10 = vrot.slane %v548_v54, 2  ;;  %v558_v28 = vrot.slane %v557_v30, 2  ;;  %v514_v16 = vadd.f32 %v513_v46, %v512_v35  ;;  %v3490_v35 = vld [vmem:[#allocation42_spill] sm:$0xff] }
 0x10d   : > { %3477 = vst [vmem:[#allocation19_spill] sm:$0xff] %v2646_v19  ;;  %v2651_v32 = vmul.f32 %v2019_v49, %v3478_v9  ;;  %3482 = vst [vmem:[#allocation21_spill] sm:$0xff] %v2656_v58  ;;  %v523_v25 = vadd.f32 %v522_v3, %v521_v60  ;;  %v567_v29 = vrot.slane %v566_v42, 2  ;;  %v576_v52 = vrot.slane %v575_v6, 2  ;;  %v3486_v58 = vld [vmem:[#allocation38_spill] sm:$0xff]  ;;  %v3487_v19 = vld [vmem:[#allocation39_spill] sm:$0xff] }
 0x10e   : > { %3484 = vst [vmem:[#allocation22_spill] sm:$0xff] %v2661_v37  ;;  %v580_v9 = vadd.f32 %v2174_v48, %v2154_v7  ;;  %v598_v41 = vadd.f32 %v2184_v11, %v3486_v58  ;;  %v3488_v49 = vld [vmem:[#allocation40_spill] sm:$0xff]  ;;  %v616_v37 = vadd.f32 %v2254_v44, %v2234_v38  ;;  %v625_v3 = vadd.f32 %v2259_v57, %v2239_v51  ;;  %v3489_v48 = vld [vmem:[#allocation41_spill] sm:$0xff]  ;;  %v3491_v11 = vld [vmem:[#allocation43_spill] sm:$0xff] }
 0x10f   : > { %3479 = vst [vmem:[#allocation20_spill] sm:$0xff] %v2651_v32  ;;  %v3485_v32 = vld [vmem:[#allocation37_spill] sm:$0xff]  ;;  %v607_v61 = vadd.f32 %v3488_v49, %v3487_v19  ;;  %v634_v46 = vadd.f32 %v2264_v45, %v2244_v39  ;;  %v643_v7 = vadd.f32 %v2269_v62, %v2249_v56  ;;  %v3492_v58 = vld [vmem:[#allocation44_spill] sm:$0xff]  ;;  %v3494_v57 = vld [vmem:[#allocation50_spill] sm:$0xff] }
 0x110   : > { %v589_v8 = vadd.f32 %v2179_v33, %v3485_v32  ;;  %v581_v33 = vadd.f32 %v580_v9, %v3489_v48  ;;  %v599_v32 = vadd.f32 %v598_v41, %v3491_v11  ;;  %v617_v49 = vadd.f32 %v616_v37, %v2274_v50  ;;  %v3493_v38 = vld [vmem:[#allocation49_spill] sm:$0xff]  ;;  %v3496_v13 = vld [vmem:[#allocation46_spill] sm:$0xff]  ;;  %v3497_v62 = vld [vmem:[#allocation47_spill] sm:$0xff] }
 0x111   : > { %v608_v19 = vadd.f32 %v607_v61, %v3492_v58  ;;  %v626_v44 = vadd.f32 %v625_v3, %v3493_v38  ;;  %v635_v51 = vadd.f32 %v634_v46, %v2284_v18  ;;  %v644_v22 = vadd.f32 %v643_v7, %v3494_v57  ;;  %v3495_v39 = vld [vmem:[#allocation45_spill] sm:$0xff]  ;;  %v3498_v48 = vld [vmem:[#allocation48_spill] sm:$0xff] }
 0x112   : > { %v590_v60 = vadd.f32 %v589_v8, %v3490_v35  ;;  %v582_v45 = vadd.f32 %v581_v33, %v3495_v39  ;;  %v600_v9 = vadd.f32 %v599_v32, %v3497_v62  ;;  %v618_v41 = vadd.f32 %v617_v49, %v2294_v26  ;;  %v3499_v35 = vld [vmem:[#allocation51_spill] sm:$0xff]  ;;  %v3500_v37 = vld [vmem:[#allocation52_spill] sm:$0xff] }
 0x113   : > { %v609_v8 = vadd.f32 %v608_v19, %v3498_v48  ;;  %v627_v61 = vadd.f32 %v626_v44, %v3499_v35  ;;  %v636_v50 = vadd.f32 %v635_v51, %v2304_v21  ;;  %v645_v3 = vadd.f32 %v644_v22, %v3500_v37 }
 0x114   : > { %v591_v56 = vadd.f32 %v590_v60, %v3496_v13  ;;  %v532_v11 = vadd.f32 %v531_v1, %v530_v15  ;;  %v541_v18 = vadd.f32 %v540_v24, %v539_v17  ;;  %v583_v46 = vrot.slane %v582_v45, 4 }
 0x115   : > { %v550_v58 = vadd.f32 %v549_v10, %v548_v54  ;;  %v559_v33 = vadd.f32 %v558_v28, %v557_v30  ;;  %v568_v38 = vadd.f32 %v567_v29, %v566_v42  ;;  %v577_v13 = vadd.f32 %v576_v52, %v575_v6 }
 0x116   : > { %v592_v7 = vrot.slane %v591_v56, 4  ;;  %v601_v60 = vrot.slane %v600_v9, 4  ;;  %v610_v32 = vrot.slane %v609_v8, 4  ;;  %v619_v57 = vrot.slane %v618_v41, 4 }
 0x117   : > { %v628_v19 = vrot.slane %v627_v61, 4  ;;  %v584_v39 = vadd.f32 %v583_v46, %v582_v45  ;;  %v637_v49 = vrot.slane %v636_v50, 4  ;;  %v646_v44 = vrot.slane %v645_v3, 4 }
 0x118   : > { %v593_v26 = vadd.f32 %v592_v7, %v591_v56  ;;  %v515_v62 = vrot.slane %v514_v16, 1  ;;  %v524_v21 = vrot.slane %v523_v25, 1  ;;  %v533_v51 = vrot.slane %v532_v11, 1 }
 0x119   : > { %v542_v22 = vrot.slane %v541_v18, 1  ;;  %v551_v15 = vrot.slane %v550_v58, 1  ;;  %v560_v17 = vrot.slane %v559_v33, 1  ;;  %v569_v1 = vrot.slane %v568_v38, 1 }
 0x11a   : > { %v578_v24 = vrot.slane %v577_v13, 1  ;;  %v602_v54 = vadd.f32 %v601_v60, %v600_v9  ;;  %v611_v30 = vadd.f32 %v610_v32, %v609_v8  ;;  %v620_v42 = vadd.f32 %v619_v57, %v618_v41  ;;  %v3503_v32 = vld [vmem:[#allocation55_spill] sm:$0xff] }
 0x11b   : > { %v629_v6 = vadd.f32 %v628_v19, %v627_v61  ;;  %v585_v10 = vrot.slane %v584_v39, 2  ;;  %v594_v28 = vrot.slane %v593_v26, 2  ;;  %v638_v29 = vadd.f32 %v637_v49, %v636_v50 }
 0x11c   : > { %v647_v52 = vadd.f32 %v646_v44, %v645_v3  ;;  %v2695_v45 = vadd.f32 %v515_v62, %v514_v16  ;;  %v2697_v56 = vadd.f32 %v524_v21, %v523_v25  ;;  %v2699_v48 = vadd.f32 %v533_v51, %v532_v11  ;;  %v3506_v44 = vld [vmem:[#allocation65_spill] sm:$0xff]  ;;  %v3509_v21 = vld [vmem:[#allocation58_spill] sm:$0xff] }
 0x11d   : > { %v2701_v35 = vadd.f32 %v542_v22, %v541_v18  ;;  %v2703_v37 = vadd.f32 %v551_v15, %v550_v58  ;;  %v2705_v46 = vadd.f32 %v560_v17, %v559_v33  ;;  %v2707_v9 = vadd.f32 %v569_v1, %v568_v38  ;;  %v3501_v18 = vld [vmem:[#allocation53_spill] sm:$0xff]  ;;  %v3502_v33 = vld [vmem:[#allocation54_spill] sm:$0xff]  ;;  %v3511_v15 = vld [vmem:[#allocation60_spill] sm:$0xff] }
 0x11e   : > { %v2709_v8 = vadd.f32 %v578_v24, %v577_v13  ;;  %v603_v41 = vrot.slane %v602_v54, 2  ;;  %v612_v61 = vrot.slane %v611_v30, 2  ;;  %v621_v50 = vrot.slane %v620_v42, 2  ;;  %v3504_v13 = vld [vmem:[#allocation56_spill] sm:$0xff]  ;;  %v3508_v62 = vld [vmem:[#allocation57_spill] sm:$0xff] }
 0x11f   : > { %v630_v3 = vrot.slane %v629_v6, 2  ;;  %v586_v16 = vadd.f32 %v585_v10, %v584_v39  ;;  %v595_v7 = vadd.f32 %v594_v28, %v593_v26  ;;  %v639_v25 = vrot.slane %v638_v29, 2  ;;  %v3505_v26 = vld [vmem:[#allocation66_spill] sm:$0xff]  ;;  %v3512_v1 = vld [vmem:[#allocation8_spill] sm:$0xff]  ;;  %v3514_v10 = vld [vmem:[#allocation9_spill] sm:$0xff] }
 0x120   : > { %v648_v60 = vrot.slane %v647_v52, 2  ;;  %v652_v11 = vadd.f32 %v2334_v4, %v2314_v14  ;;  %v661_v58 = vadd.f32 %v2339_v47, %v3501_v18  ;;  %v670_v38 = vadd.f32 %v2344_v59, %v3502_v33  ;;  %v3507_v14 = vld [vmem:[#allocation67_spill] sm:$0xff]  ;;  %v3517_v33 = vld [vmem:[#allocation62_spill] sm:$0xff] }
 0x121   : > { %v679_v57 = vadd.f32 %v3504_v13, %v3503_v32  ;;  %v688_v19 = vadd.f32 %v2414_v0, %v2394_v2  ;;  %v697_v39 = vadd.f32 %v2419_v23, %v2399_v31  ;;  %v706_v49 = vadd.f32 %v3505_v26, %v2404_v43  ;;  %v3510_v59 = vld [vmem:[#allocation59_spill] sm:$0xff]  ;;  %v3513_v2 = vld [vmem:[#allocation68_spill] sm:$0xff]  ;;  %v3515_v23 = vld [vmem:[#allocation69_spill] sm:$0xff] }
 0x122   : > { %v715_v4 = vadd.f32 %v3507_v14, %v3506_v44  ;;  %v653_v47 = vadd.f32 %v652_v11, %v3508_v62  ;;  %v662_v51 = vadd.f32 %v661_v58, %v3509_v21  ;;  %v671_v22 = vadd.f32 %v670_v38, %v3510_v59  ;;  %v3516_v43 = vld [vmem:[#allocation61_spill] sm:$0xff]  ;;  %v3518_v13 = vld [vmem:[#allocation63_spill] sm:$0xff]  ;;  %v3519_v26 = vld [vmem:[#allocation64_spill] sm:$0xff] }
 0x123   : > { %v680_v17 = vadd.f32 %v679_v57, %v3511_v15  ;;  %v689_v24 = vadd.f32 %v688_v19, %v3512_v1  ;;  %v698_v0 = vadd.f32 %v697_v39, %v3513_v2  ;;  %v707_v31 = vadd.f32 %v706_v49, %v3514_v10  ;;  %v3520_v44 = vld [vmem:[#allocation10_spill] sm:$0xff]  ;;  %v3522_v62 = vld [vmem:[#allocation11_spill] sm:$0xff] }
 0x124   : > { %v716_v28 = vadd.f32 %v715_v4, %v3515_v23  ;;  %v654_v18 = vadd.f32 %v653_v47, %v3516_v43  ;;  %v663_v32 = vadd.f32 %v662_v51, %v3517_v33  ;;  %v672_v11 = vadd.f32 %v671_v22, %v3518_v13  ;;  %v3521_v14 = vld [vmem:[#allocation70_spill] sm:$0xff]  ;;  %v3523_v21 = vld [vmem:[#allocation71_spill] sm:$0xff] }
 0x125   : > { %v681_v58 = vadd.f32 %v680_v17, %v3519_v26  ;;  %v690_v38 = vadd.f32 %v689_v24, %v3520_v44  ;;  %v699_v57 = vadd.f32 %v698_v0, %v3521_v14  ;;  %v708_v19 = vadd.f32 %v707_v31, %v3522_v62 }
 0x126   : > { %v717_v39 = vadd.f32 %v716_v28, %v3523_v21  ;;  %v604_v59 = vadd.f32 %v603_v41, %v602_v54  ;;  %v613_v49 = vadd.f32 %v612_v61, %v611_v30  ;;  %v655_v15 = vrot.slane %v654_v18, 4 }
 0x127   : > { %v664_v4 = vrot.slane %v663_v32, 4  ;;  %v622_v1 = vadd.f32 %v621_v50, %v620_v42  ;;  %v631_v47 = vadd.f32 %v630_v3, %v629_v6  ;;  %v640_v2 = vadd.f32 %v639_v25, %v638_v29 }
 0x128   : > { %v649_v51 = vadd.f32 %v648_v60, %v647_v52  ;;  %v673_v10 = vrot.slane %v672_v11, 4  ;;  %v682_v22 = vrot.slane %v681_v58, 4  ;;  %v691_v23 = vrot.slane %v690_v38, 4 }
 0x129   : > { %v700_v17 = vrot.slane %v699_v57, 4  ;;  %v656_v43 = vadd.f32 %v655_v15, %v654_v18  ;;  %v665_v24 = vadd.f32 %v664_v4, %v663_v32  ;;  %v709_v33 = vrot.slane %v708_v19, 4 }
 0x12a   : > { %v718_v0 = vrot.slane %v717_v39, 4  ;;  %v587_v13 = vrot.slane %v586_v16, 1  ;;  %v596_v31 = vrot.slane %v595_v7, 1  ;;  %v605_v26 = vrot.slane %v604_v59, 1 }
 0x12b   : > { %v614_v28 = vrot.slane %v613_v49, 1  ;;  %v623_v54 = vrot.slane %v622_v1, 1  ;;  %v632_v30 = vrot.slane %v631_v47, 1  ;;  %v641_v41 = vrot.slane %v640_v2, 1 }
 0x12c   : > { %v650_v61 = vrot.slane %v649_v51, 1  ;;  %v674_v42 = vadd.f32 %v673_v10, %v672_v11  ;;  %v683_v6 = vadd.f32 %v682_v22, %v681_v58  ;;  %v692_v29 = vadd.f32 %v691_v23, %v690_v38  ;;  %v3525_v10 = vld [vmem:[#allocation72_spill] sm:$0xff]  ;;  %v3528_v23 = vld [vmem:[#allocation73_spill] sm:$0xff] }
 0x12d   : > { %v701_v52 = vadd.f32 %v700_v17, %v699_v57  ;;  %v657_v50 = vrot.slane %v656_v43, 2  ;;  %v666_v3 = vrot.slane %v665_v24, 2  ;;  %v710_v25 = vadd.f32 %v709_v33, %v708_v19  ;;  %v3530_v33 = vld [vmem:[#allocation34_spill] sm:$0xff] }
 0x12e   : > { %v719_v60 = vadd.f32 %v718_v0, %v717_v39  ;;  %v2743_v18 = vadd.f32 %v587_v13, %v586_v16  ;;  %v2745_v32 = vadd.f32 %v596_v31, %v595_v7  ;;  %v2747_v44 = vadd.f32 %v605_v26, %v604_v59  ;;  %v3524_v59 = vld [vmem:[#allocation12_spill] sm:$0xff]  ;;  %v3531_v13 = vld [vmem:[#allocation35_spill] sm:$0xff] }
 0x12f   : > { %v2749_v14 = vadd.f32 %v614_v28, %v613_v49  ;;  %v2751_v62 = vadd.f32 %v623_v54, %v622_v1  ;;  %v2753_v21 = vadd.f32 %v632_v30, %v631_v47  ;;  %v2755_v11 = vadd.f32 %v641_v41, %v640_v2  ;;  %v3526_v1 = vld [vmem:[#allocation14_spill] sm:$0xff]  ;;  %v3527_v47 = vld [vmem:[#allocation13_spill] sm:$0xff]  ;;  %v3532_v31 = vld [vmem:[#allocation15_spill] sm:$0xff] }
 0x130   : > { %v2757_v58 = vadd.f32 %v650_v61, %v649_v51  ;;  %v675_v38 = vrot.slane %v674_v42, 2  ;;  %v684_v57 = vrot.slane %v683_v6, 2  ;;  %v693_v19 = vrot.slane %v692_v29, 2  ;;  %v3533_v28 = vld [vmem:[#allocation16_spill] sm:$0xff]  ;;  %v3535_v41 = vld [vmem:[#allocation29_spill] sm:$0xff] }
 0x131   : > { %v702_v39 = vrot.slane %v701_v52, 2  ;;  %v658_v16 = vadd.f32 %v657_v50, %v656_v43  ;;  %v667_v15 = vadd.f32 %v666_v3, %v665_v24  ;;  %v711_v7 = vrot.slane %v710_v25, 2  ;;  %v3529_v43 = vld [vmem:[#allocation36_spill] sm:$0xff]  ;;  %v3537_v50 = vld [vmem:[#allocation18_spill] sm:$0xff] }
 0x132   : > { %v720_v4 = vrot.slane %v719_v60, 2  ;;  %v724_v49 = vadd.f32 %v2494_v63, %v3524_v59  ;;  %v733_v22 = vadd.f32 %v3526_v1, %v3525_v10  ;;  %v742_v2 = vadd.f32 %v2504_v55, %v3527_v47  ;;  %v3534_v55 = vld [vmem:[#allocation28_spill] sm:$0xff]  ;;  %v3539_v10 = vld [vmem:[#allocation31_spill] sm:$0xff]  ;;  %v3541_v47 = vld [vmem:[#allocation33_spill] sm:$0xff] }
 0x133   : > { %v751_v51 = vadd.f32 %v2509_v53, %v3528_v23  ;;  %v760_v17 = vadd.f32 %v2606_v36, %v2586_v12  ;;  %v769_v24 = vadd.f32 %v3529_v43, %v2591_v34  ;;  %v778_v0 = vadd.f32 %v2616_v5, %v3530_v33  ;;  %v3536_v36 = vld [vmem:[#allocation17_spill] sm:$0xff]  ;;  %v3538_v5 = vld [vmem:[#allocation30_spill] sm:$0xff]  ;;  %v3540_v1 = vld [vmem:[#allocation32_spill] sm:$0xff] }
 0x134   : > { %v787_v63 = vadd.f32 %v2621_v40, %v3531_v13  ;;  %v725_v26 = vadd.f32 %v724_v49, %v3532_v31  ;;  %v734_v54 = vadd.f32 %v733_v22, %v3533_v28  ;;  %v743_v30 = vadd.f32 %v742_v2, %v3534_v55  ;;  %v3542_v2 = vld [vmem:[#allocation19_spill] sm:$0xff]  ;;  %v3545_v28 = vld [vmem:[#allocation22_spill] sm:$0xff] }
 0x135   : > { %v752_v53 = vadd.f32 %v751_v51, %v3535_v41  ;;  %v761_v61 = vadd.f32 %v760_v17, %v2626_v27  ;;  %v770_v12 = vadd.f32 %v769_v24, %v2631_v20  ;;  %v779_v34 = vadd.f32 %v778_v0, %v3536_v36  ;;  %v3543_v51 = vld [vmem:[#allocation20_spill] sm:$0xff]  ;;  %v3544_v27 = vld [vmem:[#allocation21_spill] sm:$0xff] }
 0x136   : > { %v788_v3 = vadd.f32 %v787_v63, %v3537_v50  ;;  %v726_v59 = vadd.f32 %v725_v26, %v3538_v5  ;;  %v735_v40 = vadd.f32 %v734_v54, %v3539_v10  ;;  %v744_v49 = vadd.f32 %v743_v30, %v3540_v1 }
 0x137   : > { %v753_v22 = vadd.f32 %v752_v53, %v3541_v47  ;;  %v676_v23 = vadd.f32 %v675_v38, %v674_v42  ;;  %v762_v43 = vadd.f32 %v761_v61, %v3542_v2  ;;  %v771_v33 = vadd.f32 %v770_v12, %v3543_v51 }
 0x138   : > { %v780_v17 = vadd.f32 %v779_v34, %v3544_v27  ;;  %v685_v20 = vadd.f32 %v684_v57, %v683_v6  ;;  %v727_v24 = vrot.slane %v726_v59, 4  ;;  %v736_v0 = vrot.slane %v735_v40, 4 }
 0x139   : > { %v745_v13 = vrot.slane %v744_v49, 4  ;;  %v754_v63 = vrot.slane %v753_v22, 4  ;;  %v763_v31 = vrot.slane %v762_v43, 4  ;;  %v772_v26 = vrot.slane %v771_v33, 4 }
 0x13a   : > { %v789_v54 = vadd.f32 %v788_v3, %v3545_v28  ;;  %v694_v55 = vadd.f32 %v693_v19, %v692_v29  ;;  %v703_v30 = vadd.f32 %v702_v39, %v701_v52  ;;  %v712_v41 = vadd.f32 %v711_v7, %v710_v25 }
 0x13b   : > { %v721_v53 = vadd.f32 %v720_v4, %v719_v60  ;;  %v728_v42 = vadd.f32 %v727_v24, %v726_v59  ;;  %v737_v38 = vadd.f32 %v736_v0, %v735_v40  ;;  %v746_v61 = vadd.f32 %v745_v13, %v744_v49 }
 0x13c   : > { %v781_v36 = vrot.slane %v780_v17, 4  ;;  %v659_v12 = vrot.slane %v658_v16, 1  ;;  %v668_v50 = vrot.slane %v667_v15, 1  ;;  %v677_v34 = vrot.slane %v676_v23, 1 }
 0x13d   : > { %v686_v6 = vrot.slane %v685_v20, 1  ;;  %v755_v57 = vadd.f32 %v754_v63, %v753_v22  ;;  %v764_v5 = vadd.f32 %v763_v31, %v762_v43  ;;  %v773_v10 = vadd.f32 %v772_v26, %v771_v33 }
 0x13e   : > { %v790_v1 = vrot.slane %v789_v54, 4  ;;  %v695_v47 = vrot.slane %v694_v55, 1  ;;  %v704_v2 = vrot.slane %v703_v30, 1  ;;  %v713_v51 = vrot.slane %v712_v41, 1 }
 0x13f   : > { %v722_v3 = vrot.slane %v721_v53, 1  ;;  %v729_v29 = vrot.slane %v728_v42, 2  ;;  %v738_v52 = vrot.slane %v737_v38, 2  ;;  %v747_v25 = vrot.slane %v746_v61, 2 }
 0x140   : > { %v782_v60 = vadd.f32 %v781_v36, %v780_v17  ;;  %v2791_v19 = vadd.f32 %v659_v12, %v658_v16  ;;  %v2793_v39 = vadd.f32 %v668_v50, %v667_v15  ;;  %v2795_v7 = vadd.f32 %v677_v34, %v676_v23 }
 0x141   : > { %v2797_v4 = vadd.f32 %v686_v6, %v685_v20  ;;  %v756_v59 = vrot.slane %v755_v57, 2  ;;  %v765_v40 = vrot.slane %v764_v5, 2  ;;  %v774_v49 = vrot.slane %v773_v10, 2 }
 0x142   : > { %v791_v22 = vadd.f32 %v790_v1, %v789_v54  ;;  %v2799_v43 = vadd.f32 %v695_v47, %v694_v55  ;;  %v2801_v33 = vadd.f32 %v704_v2, %v703_v30  ;;  %v2803_v27 = vadd.f32 %v713_v51, %v712_v41 }
 0x143   : > { %v2805_v24 = vadd.f32 %v722_v3, %v721_v53  ;;  %v730_v16 = vadd.f32 %v729_v29, %v728_v42  ;;  %v739_v17 = vadd.f32 %v738_v52, %v737_v38  ;;  %v748_v15 = vadd.f32 %v747_v25, %v746_v61 }
 0x144   : > { %v783_v0 = vrot.slane %v782_v60, 2  ;;  %v796_v23 = vmax.f32 %v2695_v45, %v2703_v37  ;;  %v803_v20 = vmax.f32 %v2697_v56, %v2705_v46  ;;  %v810_v13 = vmax.f32 %v2699_v48, %v2707_v9 }
 0x145   : > { %v817_v63 = vmax.f32 %v2701_v35, %v2709_v8  ;;  %v757_v31 = vadd.f32 %v756_v59, %v755_v57  ;;  %v766_v26 = vadd.f32 %v765_v40, %v764_v5  ;;  %v775_v28 = vadd.f32 %v774_v49, %v773_v10 }
 0x146   : > { %v792_v54 = vrot.slane %v791_v22, 2  ;;  %v797_v55 = vmax.f32 %v796_v23, %v2743_v18  ;;  %v804_v30 = vmax.f32 %v803_v20, %v2745_v32  ;;  %v811_v41 = vmax.f32 %v810_v13, %v2747_v44 }
 0x147   : > { %v818_v53 = vmax.f32 %v817_v63, %v2749_v14  ;;  %v731_v42 = vrot.slane %v730_v16, 1  ;;  %v740_v38 = vrot.slane %v739_v17, 1  ;;  %v749_v61 = vrot.slane %v748_v15, 1 }
 0x148   : > { %v784_v36 = vadd.f32 %v783_v0, %v782_v60  ;;  %v798_v12 = vmax.f32 %v797_v55, %v2751_v62  ;;  %v805_v50 = vmax.f32 %v804_v30, %v2753_v21  ;;  %v812_v34 = vmax.f32 %v811_v41, %v2755_v11 }
 0x149   : > { %v819_v6 = vmax.f32 %v818_v53, %v2757_v58  ;;  %v758_v57 = vrot.slane %v757_v31, 1  ;;  %v767_v5 = vrot.slane %v766_v26, 1  ;;  %v776_v10 = vrot.slane %v775_v28, 1 }
 0x14a   : > { %v793_v1 = vadd.f32 %v792_v54, %v791_v22  ;;  %v799_v47 = vmax.f32 %v798_v12, %v2791_v19  ;;  %v806_v2 = vmax.f32 %v805_v50, %v2793_v39  ;;  %v813_v51 = vmax.f32 %v812_v34, %v2795_v7 }
 0x14b   : > { %v820_v3 = vmax.f32 %v819_v6, %v2797_v4  ;;  %v2827_v29 = vadd.f32 %v731_v42, %v730_v16  ;;  %v2829_v52 = vadd.f32 %v740_v38, %v739_v17  ;;  %v2831_v25 = vadd.f32 %v749_v61, %v748_v15 }
 0x14c   : > { %v785_v60 = vrot.slane %v784_v36, 1  ;;  %v800_v59 = vmax.f32 %v799_v47, %v2799_v43  ;;  %v807_v40 = vmax.f32 %v806_v2, %v2801_v33  ;;  %v814_v49 = vmax.f32 %v813_v51, %v2803_v27 }
 0x14d   : > { %v821_v22 = vmax.f32 %v820_v3, %v2805_v24  ;;  %v2837_v0 = vadd.f32 %v758_v57, %v757_v31  ;;  %v794_v23 = vrot.slane %v793_v1, 1  ;;  %v2843_v13 = vadd.f32 %v767_v5, %v766_v26 }
 0x14e   : > { %v801_v20 = vmax.f32 %v800_v59, %v2827_v29  ;;  %v808_v16 = vmax.f32 %v807_v40, %v2829_v52  ;;  %v815_v17 = vmax.f32 %v814_v49, %v2831_v25  ;;  %v2845_v63 = vadd.f32 %v776_v10, %v775_v28 }
 0x14f   : > { %v822_v15 = vmax.f32 %v821_v22, %v2837_v0  ;;  %v2847_v54 = vadd.f32 %v785_v60, %v784_v36  ;;  %v2849_v55 = vadd.f32 %v794_v23, %v793_v1 }
 0x150   : > { %v2852_v31 = vmax.f32 %v801_v20, %v2843_v13  ;;  %v2855_v30 = vmax.f32 %v808_v16, %v2845_v63 }
 0x151   : > { %v2858_v41 = vmax.f32 %v815_v17, %v2847_v54  ;;  %v2861_v53 = vmax.f32 %v822_v15, %v2849_v55 }
 0x152   : > { %v824_v26 = vsub.f32 %v2695_v45, %v2852_v31  ;;  %v825_v28 = vsub.f32 %v2697_v56, %v2855_v30  ;;  %v828_v61 = vsub.f32 %v2703_v37, %v2852_v31  ;;  %v829_v36 = vsub.f32 %v2705_v46, %v2855_v30 }
 0x153   : > { %v826_v42 = vsub.f32 %v2699_v48, %v2858_v41  ;;  %v827_v38 = vsub.f32 %v2701_v35, %v2861_v53  ;;  %v830_v12 = vsub.f32 %v2707_v9, %v2858_v41  ;;  %v831_v56 = vsub.f32 %v2709_v8, %v2861_v53 }
 0x154   : > { %v856_v50 = vmul.f32 1.442695, %v824_v26  ;;  %v858_v45 = vmul.f32 1.442695, %v825_v28  ;;  %v832_v48 = vsub.f32 %v2743_v18, %v2852_v31  ;;  %v864_v35 = vmul.f32 1.442695, %v828_v61 }
 0x155   : > { %v860_v34 = vmul.f32 1.442695, %v826_v42  ;;  %v862_v6 = vmul.f32 1.442695, %v827_v38  ;;  %v833_v37 = vsub.f32 %v2745_v32, %v2855_v30  ;;  %v866_v46 = vmul.f32 1.442695, %v829_v36 }
 0x156   : > { %1344 = vpow2.f32 %v856_v50  ;;  %v834_v9 = vsub.f32 %v2747_v44, %v2858_v41  ;;  %v868_v57 = vmul.f32 1.442695, %v830_v12  ;;  %v835_v5 = vsub.f32 %v2749_v14, %v2861_v53 }
 0x157   : > { %1346 = vpow2.f32 %v858_v45  ;;  %v870_v8 = vmul.f32 1.442695, %v831_v56  ;;  %v836_v18 = vsub.f32 %v2751_v62, %v2852_v31  ;;  %v872_v10 = vmul.f32 1.442695, %v832_v48 }
 0x158   : > { %1348 = vpow2.f32 %v860_v34  ;;  %v837_v32 = vsub.f32 %v2753_v21, %v2855_v30  ;;  %v874_v1 = vmul.f32 1.442695, %v833_v37  ;;  %v838_v44 = vsub.f32 %v2755_v11, %v2858_v41 }
 0x159   : > { %1350 = vpow2.f32 %v862_v6  ;;  %v876_v47 = vmul.f32 1.442695, %v834_v9  ;;  %v839_v14 = vsub.f32 %v2757_v58, %v2861_v53  ;;  %v878_v2 = vmul.f32 1.442695, %v835_v5 }
 0x15a   : > { %1352 = vpow2.f32 %v864_v35  ;;  %v840_v62 = vsub.f32 %v2791_v19, %v2852_v31  ;;  %v880_v51 = vmul.f32 1.442695, %v836_v18  ;;  %v841_v21 = vsub.f32 %v2793_v39, %v2855_v30 }
 0x15b   : > { %1354 = vpow2.f32 %v866_v46  ;;  %v882_v3 = vmul.f32 1.442695, %v837_v32  ;;  %v842_v11 = vsub.f32 %v2795_v7, %v2858_v41  ;;  %v884_v59 = vmul.f32 1.442695, %v838_v44 }
 0x15c   : > { %1356 = vpow2.f32 %v868_v57  ;;  %v843_v40 = vsub.f32 %v2797_v4, %v2861_v53  ;;  %v886_v19 = vmul.f32 1.442695, %v839_v14  ;;  %v844_v39 = vsub.f32 %v2799_v43, %v2852_v31 }
 0x15d   : > { %1358 = vpow2.f32 %v870_v8  ;;  %v888_v22 = vmul.f32 1.442695, %v840_v62  ;;  %v845_v7 = vsub.f32 %v2801_v33, %v2855_v30  ;;  %v890_v20 = vmul.f32 1.442695, %v841_v21 }
 0x15e   : > { %1360 = vpow2.f32 %v872_v10  ;;  %v846_v4 = vsub.f32 %v2803_v27, %v2858_v41  ;;  %v892_v17 = vmul.f32 1.442695, %v842_v11  ;;  %v847_v43 = vsub.f32 %v2805_v24, %v2861_v53 }
 0x15f   : > { %1362 = vpow2.f32 %v874_v1  ;;  %v894_v26 = vmul.f32 1.442695, %v843_v40  ;;  %v848_v33 = vsub.f32 %v2827_v29, %v2852_v31  ;;  %v896_v42 = vmul.f32 1.442695, %v844_v39 }
 0x160   : > { %v2899_v60 = vpop.eup %1344  ;;  %1364 = vpow2.f32 %v876_v47  ;;  %v849_v27 = vsub.f32 %v2829_v52, %v2855_v30  ;;  %v850_v61 = vsub.f32 %v2831_v25, %v2858_v41  ;;  %v898_v24 = vmul.f32 1.442695, %v845_v7 }
 0x161   : > { %v2903_v58 = vpop.eup %1346  ;;  %1366 = vpow2.f32 %v878_v2  ;;  %v851_v12 = vsub.f32 %v2837_v0, %v2861_v53  ;;  %v852_v29 = vsub.f32 %v2843_v13, %v2852_v31  ;;  %v900_v50 = vmul.f32 1.442695, %v846_v4 }
 0x162   : > { %v2907_v49 = vpop.eup %1348  ;;  %1368 = vpow2.f32 %v880_v51  ;;  %v853_v52 = vsub.f32 %v2845_v63, %v2855_v30  ;;  %v902_v25 = vmul.f32 1.442695, %v847_v43  ;;  %v854_v0 = vsub.f32 %v2847_v54, %v2858_v41 }
 0x163   : > { %v2911_v23 = vpop.eup %1350  ;;  %1370 = vpow2.f32 %v882_v3  ;;  %v904_v6 = vmul.f32 1.442695, %v848_v33  ;;  %v855_v48 = vsub.f32 %v2849_v55, %v2861_v53  ;;  %v906_v63 = vmul.f32 1.442695, %v849_v27 }
 0x164   : > { %v2915_v16 = vpop.eup %1352  ;;  %1372 = vpow2.f32 %v884_v59  ;;  %v908_v37 = vmul.f32 1.442695, %v850_v61  ;;  %v910_v9 = vmul.f32 1.442695, %v851_v12  ;;  %v912_v5 = vmul.f32 1.442695, %v852_v29 }
 0x165   : > { %v2919_v15 = vpop.eup %1354  ;;  %1374 = vpow2.f32 %v886_v19  ;;  %v952_v34 = vrot.slane %v2915_v16, 7  ;;  %v914_v32 = vmul.f32 1.442695, %v853_v52  ;;  %v916_v14 = vmul.f32 1.442695, %v854_v0 }
 0x166   : > { %v2923_v28 = vpop.eup %1356  ;;  %1376 = vpow2.f32 %v888_v22  ;;  %v973_v13 = vrot.slane %v2919_v15, 7  ;;  %v918_v21 = vmul.f32 1.442695, %v855_v48 }
 0x167   : > { %v2927_v38 = vpop.eup %1358  ;;  %1378 = vpow2.f32 %v890_v20  ;;  %v987_v30 = vrot.slane %v2923_v28, 7  ;;  %v954_v57 = vsel %vm953_vm0, %v952_v34, %v2899_v60 }
 0x168   : > { %v2933_v36 = vpop.eup %1360  ;;  %1380 = vpow2.f32 %v892_v17  ;;  %v1001_v54 = vrot.slane %v2927_v38, 7  ;;  %v974_v8 = vsel %vm953_vm0, %v973_v13, %v2903_v58 }
 0x169   : > { %v2939_v45 = vpop.eup %1362  ;;  %1382 = vpow2.f32 %v894_v26  ;;  %v955_v46 = vrot.slane %v2933_v36, 6  ;;  %v988_v1 = vsel %vm953_vm0, %v987_v30, %v2907_v49 }
 0x16a   : > { %v2944_v56 = vpop.eup %1364  ;;  %1384 = vpow2.f32 %v896_v42  ;;  %v975_v55 = vrot.slane %v2939_v45, 6  ;;  %v1002_v62 = vsel %vm953_vm0, %v1001_v54, %v2911_v23 }
 0x16b   : > { %v2949_v31 = vpop.eup %1366  ;;  %1386 = vpow2.f32 %v898_v24  ;;  %v989_v18 = vrot.slane %v2944_v56, 6  ;;  %v957_v2 = vsel %vm956_vm1, %v955_v46, %v954_v57 }
 0x16c   : > { %v2954_v35 = vpop.eup %1368  ;;  %1388 = vpow2.f32 %v900_v50  ;;  %v1003_v44 = vrot.slane %v2949_v31, 6  ;;  %v976_v11 = vsel %vm956_vm1, %v975_v55, %v974_v8 }
 0x16d   : > { %v2958_v41 = vpop.eup %1370  ;;  %1390 = vpow2.f32 %v902_v25  ;;  %v958_v3 = vrot.slane %v2954_v35, 5  ;;  %v990_v19 = vsel %vm956_vm1, %v989_v18, %v988_v1 }
 0x16e   : > { %v2963_v53 = vpop.eup %1372  ;;  %1392 = vpow2.f32 %v904_v6  ;;  %v977_v40 = vrot.slane %v2958_v41, 5  ;;  %v1004_v20 = vsel %vm956_vm1, %v1003_v44, %v1002_v62 }
 0x16f   : > { %v2968_v10 = vpop.eup %1374  ;;  %1394 = vpow2.f32 %v906_v63  ;;  %v960_v22 = vsel %vm959_vm2, %v958_v3, %v957_v2  ;;  %v991_v7 = vrot.slane %v2963_v53, 5 }
 0x170   : > { %v2973_v47 = vpop.eup %1376  ;;  %1396 = vpow2.f32 %v908_v37  ;;  %v978_v43 = vsel %vm959_vm2, %v977_v40, %v976_v11  ;;  %v1005_v26 = vrot.slane %v2968_v10, 5 }
 0x171   : > { %v2978_v51 = vpop.eup %1378  ;;  %1398 = vpow2.f32 %v910_v9  ;;  %v961_v17 = vrot.slane %v2973_v47, 4  ;;  %v992_v27 = vsel %vm959_vm2, %v991_v7, %v990_v19 }
 0x172   : > { %v2982_v59 = vpop.eup %1380  ;;  %1400 = vpow2.f32 %v912_v5  ;;  %v979_v42 = vrot.slane %v2978_v51, 4  ;;  %v1006_v29 = vsel %vm959_vm2, %v1005_v26, %v1004_v20 }
 0x173   : > { %v2986_v39 = vpop.eup %1382  ;;  %1402 = vpow2.f32 %v914_v32  ;;  %v963_v24 = vsel %vm962_vm3, %v961_v17, %v960_v22  ;;  %v993_v12 = vrot.slane %v2982_v59, 4 }
 0x174   : > { %v2991_v4 = vpop.eup %1384  ;;  %1404 = vpow2.f32 %v916_v14  ;;  %v980_v25 = vsel %vm962_vm3, %v979_v42, %v978_v43  ;;  %v1007_v34 = vrot.slane %v2986_v39, 4  ;;  %v1043_v42 = vlaneseq }
 0x175   : > { %v2996_v33 = vpop.eup %1386  ;;  %1406 = vpow2.f32 %v918_v21  ;;  %v964_v52 = vrot.slane %v2991_v4, 3  ;;  %v994_v13 = vsel %vm962_vm3, %v993_v12, %v992_v27 }
 0x176   : > { %v3000_v61 = vpop.eup %1388  ;;  %v981_v6 = vrot.slane %v2996_v33, 3  ;;  %v1008_v37 = vsel %vm962_vm3, %v1007_v34, %v1006_v29 }
 0x177   : > { %v3005_v50 = vpop.eup %1390  ;;  %v966_v63 = vsel %vm965_vm4, %v964_v52, %v963_v24  ;;  %v995_v30 = vrot.slane %v3000_v61, 3 }
 0x178   : > { %v3010_v0 = vpop.eup %1392  ;;  %v982_v9 = vsel %vm965_vm4, %v981_v6, %v980_v25  ;;  %v1009_v57 = vrot.slane %v3005_v50, 3 }
 0x179   : > { %v3014_v48 = vpop.eup %1394  ;;  %v967_v54 = vrot.slane %v3010_v0, 2  ;;  %v996_v8 = vsel %vm965_vm4, %v995_v30, %v994_v13 }
 0x17a   : > { %v3019_v46 = vpop.eup %1396  ;;  %v983_v5 = vrot.slane %v3014_v48, 2  ;;  %v1010_v44 = vsel %vm965_vm4, %v1009_v57, %v1008_v37 }
 0x17b   : > { %v3024_v55 = vpop.eup %1398  ;;  %v969_v32 = vsel %vm968_vm5, %v967_v54, %v966_v63  ;;  %v997_v1 = vrot.slane %v3019_v46, 2  ;;  %v1044_v63 = vshrl.u32 %v1043_v42, 7 }
 0x17c   : > { %v3028_v18 = vpop.eup %1400  ;;  %v984_v62 = vsel %vm968_vm5, %v983_v5, %v982_v9  ;;  %v1011_v21 = vrot.slane %v3024_v55, 2 }
 0x17d   : > { %v3033_v14 = vpop.eup %1402  ;;  %v970_v2 = vrot.slane %v3028_v18, 1  ;;  %v998_v40 = vsel %vm968_vm5, %v997_v1, %v996_v8  ;;  %v1045_v1 = vsub.s32 0, %v1044_v63 }
 0x17e   : > { %v3038_v3 = vpop.eup %1404  ;;  %v985_v11 = vrot.slane %v3033_v14, 1  ;;  %v1012_v20 = vsel %vm968_vm5, %v1011_v21, %v1010_v44 }
 0x17f   : > { %v3042_v19 = vpop.eup %1406  ;;  %v972_v22 = vsel %vm971_vm6, %v970_v2, %v969_v32  ;;  %v999_v7 = vrot.slane %v3038_v3, 1 }
 0x180   : > { %v986_v17 = vsel %vm971_vm6, %v985_v11, %v984_v62  ;;  %v1013_v43 = vrot.slane %v3042_v19, 1  ;;  %v1019_v26 = vrot.slane %v972_v22, 4 }
 0x181   : > { %v1000_v27 = vsel %vm971_vm6, %v999_v7, %v998_v40  ;;  %v1025_v24 = vrot.slane %v986_v17, 4 }
 0x182   : > { %v1014_v12 = vsel %vm971_vm6, %v1013_v43, %v1012_v20  ;;  %v1020_v29 = vadd.f32 %v1019_v26, %v972_v22  ;;  %v1031_v52 = vrot.slane %v1000_v27, 4 }
 0x183   : > { %v1026_v25 = vadd.f32 %v1025_v24, %v986_v17  ;;  %v1037_v34 = vrot.slane %v1014_v12, 4 }
 0x184   : > { %v1021_v6 = vrot.slane %v1020_v29, 2  ;;  %v1032_v13 = vadd.f32 %v1031_v52, %v1000_v27 }
 0x185   : > { %v1027_v30 = vrot.slane %v1026_v25, 2  ;;  %v1038_v37 = vadd.f32 %v1037_v34, %v1014_v12 }
 0x186   : > { %v1022_v54 = vadd.f32 %v1021_v6, %v1020_v29  ;;  %v1033_v9 = vrot.slane %v1032_v13, 2 }
 0x187   : > { %v1028_v57 = vadd.f32 %v1027_v30, %v1026_v25  ;;  %v1039_v5 = vrot.slane %v1038_v37, 2 }
 0x188   : > { %v1023_v8 = vrot.slane %v1022_v54, 1  ;;  %v1034_v32 = vadd.f32 %v1033_v9, %v1032_v13 }
 0x189   : > { %v1029_v44 = vrot.slane %v1028_v57, 1  ;;  %v1040_v2 = vadd.f32 %v1039_v5, %v1038_v37 }
 0x18a   : > { %v1024_v62 = vadd.f32 %v1023_v8, %v1022_v54  ;;  %v1035_v21 = vrot.slane %v1034_v32, 1 }
 0x18b   : > { %v1030_v11 = vadd.f32 %v1029_v44, %v1028_v57  ;;  %v1041_v40 = vrot.slane %v1040_v2, 1 }
 0x18c   : > { %v1036_v22 = vadd.f32 %v1035_v21, %v1034_v32  ;;  %v1046_v7 = vrot.slane %v1024_v62, %v1045_v1 }
 0x18d   : > { %v1042_v20 = vadd.f32 %v1041_v40, %v1040_v2  ;;  %v1050_v17 = vrot.slane %v1030_v11, %v1045_v1 }
 0x18e   : > { %v1054_v43 = vrot.slane %v1036_v22, %v1045_v1  ;;  %1408 = vrcp.f32 %v1046_v7 }
 0x18f   : > { %v1058_v26 = vrot.slane %v1042_v20, %v1045_v1  ;;  %1410 = vrcp.f32 %v1050_v17 }
 0x190   : > { %1412 = vrcp.f32 %v1054_v43 }
 0x191   : > { %1414 = vrcp.f32 %v1058_v26 }
 0x198   : > { %v1409_v42 = vpop.eup %1408 }
 0x199   : > { %v1411_v27 = vpop.eup %1410  ;;  %v1060_v24 = vmul.f32 %v1409_v42, %v2899_v60  ;;  %v1067_v52 = vmul.f32 %v1409_v42, %v2915_v16  ;;  %v1071_v25 = vmul.f32 %v1409_v42, %v2933_v36  ;;  %v1075_v34 = vmul.f32 %v1409_v42, %v2954_v35 }
 0x19a   : > { %v1413_v12 = vpop.eup %1412  ;;  %v1062_v29 = vmul.f32 %v1411_v27, %v2903_v58  ;;  %v1068_v63 = vmul.f32 %v1411_v27, %v2919_v15  ;;  %v1072_v30 = vmul.f32 %v1411_v27, %v2939_v45  ;;  %v1076_v37 = vmul.f32 %v1411_v27, %v2958_v41 }
 0x19b   : > { %v3056_v6 = vpop.eup %1414  ;;  %v1064_v13 = vmul.f32 %v1413_v12, %v2907_v49  ;;  %v1069_v58 = vmul.f32 %v1413_v12, %v2923_v28  ;;  %v1073_v16 = vmul.f32 %v1413_v12, %v2944_v56  ;;  %v1077_v36 = vmul.f32 %v1413_v12, %v2963_v53 }
 0x19c   : > { %v3064_v60 = vmul.f32 %v3056_v6, %v2911_v23  ;;  %v3071_v35 = vmul.f32 %v3056_v6, %v2927_v38  ;;  %v3075_v49 = vmul.f32 %v3056_v6, %v2949_v31  ;;  %v3079_v15 = vmul.f32 %v3056_v6, %v2968_v10 }
 0x19d   : > { %v1079_v23 = vmul.f32 %v1409_v42, %v2973_v47  ;;  %v1080_v28 = vmul.f32 %v1411_v27, %v2978_v51  ;;  %v1081_v45 = vmul.f32 %v1413_v12, %v2982_v59  ;;  %v3086_v56 = vmul.f32 %v3056_v6, %v2986_v39 }
 0x19e   : > { %v1083_v38 = vmul.f32 %v1409_v42, %v2991_v4  ;;  %v1084_v41 = vmul.f32 %v1411_v27, %v2996_v33  ;;  %v1085_v31 = vmul.f32 %v1413_v12, %v3000_v61  ;;  %v3093_v53 = vmul.f32 %v3056_v6, %v3005_v50 }
 0x19f   : > { %v1087_v10 = vmul.f32 %v1409_v42, %v3010_v0  ;;  %v1088_v47 = vmul.f32 %v1411_v27, %v3014_v48  ;;  %v1089_v51 = vmul.f32 %v1413_v12, %v3019_v46  ;;  %v1091_v59 = vmul.f32 %v1409_v42, %v3028_v18 }
 0x1a0   : > { %v1092_v39 = vmul.f32 %v1411_v27, %v3033_v14  ;;  %v1093_v4 = vmul.f32 %v1413_v12, %v3038_v3  ;;  %v1127_v33 = vrot.slane %v1067_v52, 7  ;;  %v1129_v54 = vrot.slane %v1071_v25, 6 }
 0x1a1   : > { %v1131_v61 = vrot.slane %v1075_v34, 5  ;;  %v1133_v9 = vrot.slane %v1079_v23, 4  ;;  %v1135_v57 = vrot.slane %v1083_v38, 3  ;;  %v1137_v50 = vrot.slane %v1087_v10, 2 }
 0x1a2   : > { %v1141_v5 = vrot.slane %v1068_v63, 7  ;;  %v1128_v0 = vsel %vm953_vm0, %v1127_v33, %v1060_v24  ;;  %v1139_v8 = vrot.slane %v1091_v59, 1  ;;  %v1143_v48 = vrot.slane %v1072_v30, 6 }
 0x1a3   : > { %v1145_v32 = vrot.slane %v1076_v37, 5  ;;  %v1130_v46 = vsel %vm956_vm1, %v1129_v54, %v1128_v0  ;;  %v1147_v14 = vrot.slane %v1080_v28, 4  ;;  %v1149_v1 = vrot.slane %v1084_v41, 3 }
 0x1a4   : > { %v1142_v18 = vsel %vm953_vm0, %v1141_v5, %v1062_v29  ;;  %v1132_v3 = vsel %vm959_vm2, %v1131_v61, %v1130_v46  ;;  %v1151_v2 = vrot.slane %v1088_v47, 2  ;;  %v1155_v62 = vrot.slane %v1069_v58, 7 }
 0x1a5   : > { %v1144_v44 = vsel %vm956_vm1, %v1143_v48, %v1142_v18  ;;  %v1134_v21 = vsel %vm962_vm3, %v1133_v9, %v1132_v3  ;;  %v1153_v40 = vrot.slane %v1092_v39, 1  ;;  %v1157_v22 = vrot.slane %v1073_v16, 6 }
 0x1a6   : > { %v1146_v11 = vsel %vm959_vm2, %v1145_v32, %v1144_v44  ;;  %v1136_v7 = vsel %vm965_vm4, %v1135_v57, %v1134_v21  ;;  %v1156_v17 = vsel %vm953_vm0, %v1155_v62, %v1064_v13  ;;  %v1159_v43 = vrot.slane %v1077_v36, 5 }
 0x1a7   : > { %v1148_v20 = vsel %vm962_vm3, %v1147_v14, %v1146_v11  ;;  %v1138_v26 = vsel %vm968_vm5, %v1137_v50, %v1136_v7  ;;  %v1158_v27 = vsel %vm956_vm1, %v1157_v22, %v1156_v17  ;;  %v1161_v24 = vrot.slane %v1081_v45, 4 }
 0x1a8   : > { %v1150_v42 = vsel %vm965_vm4, %v1149_v1, %v1148_v20  ;;  %v1140_v12 = vsel %vm971_vm6, %v1139_v8, %v1138_v26  ;;  %v1160_v52 = vsel %vm959_vm2, %v1159_v43, %v1158_v27  ;;  %v1163_v25 = vrot.slane %v1085_v31, 3 }
 0x1a9   : > { %v1152_v29 = vsel %vm968_vm5, %v1151_v2, %v1150_v42  ;;  %v1162_v63 = vsel %vm962_vm3, %v1161_v24, %v1160_v52  ;;  %v1165_v13 = vrot.slane %v1089_v51, 2  ;;  %v1169_v30 = vrot.slane %v3071_v35, 7  ;;  %1187 = vst [vmem:[%s161_s19] sm:$0xff] %v1140_v12 }
 0x1aa   : > { %v1154_v34 = vsel %vm971_vm6, %v1153_v40, %v1152_v29  ;;  %v1090_v37 = vmul.f32 %v3056_v6, %v3024_v55  ;;  %v1164_v58 = vsel %vm965_vm4, %v1163_v25, %v1162_v63  ;;  %v1167_v16 = vrot.slane %v1093_v4, 1 }
 0x1ab   : > { %v1171_v36 = vrot.slane %v3075_v49, 6  ;;  %1188 = vst [vmem:[%s161_s19 + $0x8] sm:$0xff] %v1154_v34  ;;  %v1094_v23 = vmul.f32 %v3056_v6, %v3042_v19  ;;  %v1166_v28 = vsel %vm968_vm5, %v1165_v13, %v1164_v58  ;;  %v1170_v35 = vsel %vm953_vm0, %v1169_v30, %v3064_v60 }
 0x1ac   : > { %v1173_v45 = vrot.slane %v3079_v15, 5  ;;  %v1168_v38 = vsel %vm971_vm6, %v1167_v16, %v1166_v28  ;;  %v1175_v41 = vrot.slane %v3086_v56, 4  ;;  %v1177_v31 = vrot.slane %v3093_v53, 3 }
 0x1ad   : > { %v1172_v55 = vsel %vm956_vm1, %v1171_v36, %v1170_v35  ;;  %1189 = vst [vmem:[%s161_s19 + $0x10] sm:$0xff] %v1168_v38  ;;  %v1179_v6 = vrot.slane %v1090_v37, 2  ;;  %v1181_v15 = vrot.slane %v1094_v23, 1 }
 0x1ae   : > { %v1174_v49 = vsel %vm959_vm2, %v1173_v45, %v1172_v55 }
 0x1af   : > { %v1176_v19 = vsel %vm962_vm3, %v1175_v41, %v1174_v49 }
 0x1b0   : > { %v1178_v60 = vsel %vm965_vm4, %v1177_v31, %v1176_v19 }
 0x1b1   : > { %v1180_v10 = vsel %vm968_vm5, %v1179_v6, %v1178_v60 }
 0x1b2   : > { %v1182_v56 = vsel %vm971_vm6, %v1181_v15, %v1180_v10 }
 0x1b3   : > { %1190 = vst [vmem:[%s161_s19 + $0x18] sm:$0xff] %v1182_v56 }
 0x1b4   : > { %1459 = shalt.err (!%p1456_p3)
}
 0x1b5   : > { %s1460_s29 = scalar_lea.hbm %s3143_s27, 512  ;;  %s1464_s4 = scalar_lea.hbm %s3190_s2, 1024 }
 0x1b6   : > { %p1461_p5 = scmp.ne.s32.totalorder %s3143_s27, %s1460_s29  ;;  %p1465_p9 = scmp.lt.u32.totalorder %s3143_s27, %s3190_s2 }
 0x1b7   : > { %p1466_p0 = scmp.lt.u32.totalorder %s1464_s4, %s1460_s29  ;;  %p1468_p6 = scmp.lt.u32.totalorder %s1460_s29, %s3143_s27 }
 0x1b8   : > { %p1462_p7 = pnand %p1461_p5, %p3546_p11 }
 0x1b9   : > { %p1467_p2 = por %p1466_p0, %p1465_p9 }
 0x1ba   : > { %p1463_p8 = pneg %p1462_p7 }
 0x1bb   : > { %p1469_p12 = por %p1468_p6, %p1467_p2 }
 0x1bd   : > { %p1470_p13 = pnand %p1469_p12, %p1463_p8 }
 0x1bf   : > { %1473 = shalt.err (!%p1470_p13)
}
 0x1c0   : > { %1294 = dma.vmem_to_hbm [thread:$0]  (%p3546_p11), %s3145_s24, 512, %s3143_s27, %s1192_s13  }
 0x1c1 PF: > { %s1218_s14 = sand.u32 1, %s1500_s9   ;;  %p3547_p4 = scmp.ne.s32.totalorder %s3235_s22, 0 }
 0x1c2   : > { %p3548_p10 = scmp.ge.s32.totalorder %s1512_s12, 2  ;;  %s1219_s16 = scalar_lea.sflag [#allocation4], %s1218_s14 }
 0x1c4   : > { %p1301_p1 = pnand %p3548_p10, %p3547_p4 }
 0x1c6   : > { %1495 = dma.done.wait (!%p1301_p1), %s1219_s16, 512  }
 0x1c7   : > { %1497 = vsyncadd (!%p1301_p1), %s1219_s16, 4294966784  ;;  %p15_p3 = scmp.ge.s32.totalorder %s1560_s15, 4   ;;  %s3549_s9 = smov %s1504_s10 }
 0x1c8   : > { %s3550_s10 = smov %s1508_s11  ;;  %s3551_s11 = smov %s1572_s18 }
 0x1c9   : > { %s3552_s12 = smov %s1560_s15  ;;  %17 = sbr.rel (!%p15_p3) target bundleno = 5 (0x5), region = 73 }
 0x1d0   :  { %1224 = vsyncpa [#allocation3], 1 }
 0x1d1   :  { %1226 = vsyncpa [#allocation3 + $0x1], 1 }
 0x1d2   :  { %1227 = vsyncpa [#allocation4], 1 }
 0x1d3   :  { %1229 = vsyncpa [#allocation4 + $0x1], 1 }

</bundles_post_ra>
